<compile_context>
chip_gen: v7x
topology: tpu7x:2x2x1
jax: 0.10.0
libtpu: 0.0.40
codegen_flags: <defaults>
</compile_context>

<pallas_src>
import math
from functools import partial

import jax
import jax.numpy as jnp
from jax.experimental import pallas as pl
from jax.experimental.pallas import tpu as pltpu


# ----------------------------- tiling / VMEM helpers -------------------------

_TM, _TN, _TK = 512, 512, 512      # generic tiled-linear targets (f32)
_TF = 256                          # fused-FFN hidden tile (sized for v7x 64 MiB)
_TQ, _TKV = 256, 512               # flash-attention q / kv tile targets
_VMEM_CAP = 64 * 1024 * 1024       # conservative cap across v5e/v6e/v7x


def _pick_tile(dim, target, align):
    """Largest tile <= target that is a multiple of `align` and divides `dim`;
    falls back to the full dimension (block == extent is always legal)."""
    if dim <= target:
        return dim
    t = (target // align) * align
    while t >= align:
        if dim % t == 0:
            return t
        t -= align
    return dim   # TODO(synk): cdiv grid + masked remainder for awkward dims


def _prod(shape):
    n = 1
    for s in shape:
        n *= int(s)
    return n


def _nbytes(shape, dtype):
    return _prod(shape) * jnp.dtype(dtype).itemsize


def _vmem_limit(blocks, scratch=()):
    """blocks: [(shape, dtype)] double-buffered tiles; scratch: single-buffered."""
    total = sum(2 * _nbytes(s, d) for s, d in blocks)
    total += sum(_nbytes(s, d) for s, d in scratch)
    return int(min(_VMEM_CAP, max(2 * total + (2 << 20), 8 << 20)))


# ------------------------------ in-kernel math --------------------------------

def _gelu(x):
    # Exact (erf-based) GELU matching torch F.gelu(approximate='none');
    # erf via Abramowitz-Stegun 7.1.26, |abs err| < 1.5e-7 in f32.
    # TODO(synk): swap to a tanh/EUP formulation on the bf16-throughput path.
    z = x * 0.7071067811865476
    a1, a2, a3, a4, a5 = (0.254829592, -0.284496736, 1.421413741,
                          -1.453152027, 1.061405429)
    p = 0.3275911
    za = jnp.abs(z)
    t = 1.0 / (1.0 + p * za)
    poly = ((((a5 * t + a4) * t + a3) * t + a2) * t + a1) * t
    erf_abs = 1.0 - poly * jnp.exp(-za * za)
    erf = jnp.where(z >= 0.0, erf_abs, -erf_abs)
    return 0.5 * x * (1.0 + erf)


def _layernorm(h, gamma, beta, eps):
    mu = jnp.mean(h, axis=-1, keepdims=True)
    var = jnp.mean((h - mu) ** 2, axis=-1, keepdims=True)   # biased var, torch LN
    return (h - mu) * jax.lax.rsqrt(var + eps) * gamma + beta


# --------------------------- kernel A: tiled linear ---------------------------

def _linear_kernel(x_ref, w_ref, b_ref, o_ref, acc_ref):
    k = pl.program_id(2)

    @pl.when(k == 0)
    def _():
        acc_ref[...] = jnp.zeros_like(acc_ref)

    acc_ref[...] += jnp.dot(x_ref[...], w_ref[...],
                            preferred_element_type=jnp.float32)

    @pl.when(k == pl.num_programs(2) - 1)
    def _():
        o_ref[...] = (acc_ref[...] + b_ref[...]).astype(o_ref.dtype)


def linear(x, w, b, out_dtype=jnp.float32):
    """(M, K) @ (K, N) + b on an (M, N, K) grid with an f32 accumulator."""
    M, K = x.shape
    N = w.shape[1]
    tm = _pick_tile(M, _TM, 8)
    tn = _pick_tile(N, _TN, 128)
    tk = _pick_tile(K, _TK, 128)
    grid = (M // tm, N // tn, K // tk)
    vmem = _vmem_limit([((tm, tk), x.dtype), ((tk, tn), w.dtype),
                        ((1, tn), jnp.float32), ((tm, tn), out_dtype)],
                       scratch=[((tm, tn), jnp.float32)])
    return pl.pallas_call(
        _linear_kernel,
        out_shape=jax.ShapeDtypeStruct((M, N), out_dtype),
        grid=grid,
        in_specs=[pl.BlockSpec((tm, tk), lambda i, j, k: (i, k)),
                  pl.BlockSpec((tk, tn), lambda i, j, k: (k, j)),
                  pl.BlockSpec((1, tn), lambda i, j, k: (0, j))],
        out_specs=pl.BlockSpec((tm, tn), lambda i, j, k: (i, j)),
        scratch_shapes=[pltpu.VMEM((tm, tn), jnp.float32)],
        compiler_params=pltpu.CompilerParams(
            dimension_semantics=("parallel", "parallel", "arbitrary"),
            vmem_limit_bytes=vmem),
        cost_estimate=pl.CostEstimate(
            flops=2 * M * N * K, transcendentals=0,
            bytes_accessed=int(_nbytes((M, K), x.dtype)
                               + (M // tm) * _nbytes((K, N), w.dtype)
                               + _nbytes((M, N), out_dtype))),
    )(x, w, b.astype(jnp.float32).reshape(1, N))


# -------------- kernel B: linear + bias + residual + LayerNorm ----------------

def _linear_resid_ln_kernel(x_ref, w_ref, b_ref, r_ref, g_ref, be_ref,
                            o_ref, acc_ref, *, eps):
    k = pl.program_id(1)

    @pl.when(k == 0)
    def _():
        acc_ref[...] = jnp.zeros_like(acc_ref)

    acc_ref[...] += jnp.dot(x_ref[...], w_ref[...],
                            preferred_element_type=jnp.float32)

    @pl.when(k == pl.num_programs(1) - 1)
    def _():
        h = acc_ref[...] + b_ref[...] + r_ref[...].astype(jnp.float32)
        o_ref[...] = _layernorm(h, g_ref[...], be_ref[...], eps).astype(o_ref.dtype)


def linear_residual_layernorm(x, w, b, resid, gamma, beta,
                              eps=1e-5, out_dtype=jnp.float32):
    """LayerNorm((x @ w + b) + resid), fused into the matmul epilogue."""
    M, K = x.shape
    N = w.shape[1]
    tm = _pick_tile(M, _TM, 8)
    tk = _pick_tile(K, _TK, 128)
    grid = (M // tm, K // tk)
    # TODO(synk): on a tight v7x VMEM budget the pinned (tm, N) residual block
    #             could instead be DMA'd manually near the last-k epilogue.
    vmem = _vmem_limit([((tm, tk), x.dtype), ((tk, N), w.dtype),
                        ((1, N), jnp.float32), ((tm, N), resid.dtype),
                        ((1, N), jnp.float32), ((1, N), jnp.float32),
                        ((tm, N), out_dtype)],
                       scratch=[((tm, N), jnp.float32)])
    return pl.pallas_call(
        partial(_linear_resid_ln_kernel, eps=eps),
        out_shape=jax.ShapeDtypeStruct((M, N), out_dtype),
        grid=grid,
        in_specs=[pl.BlockSpec((tm, tk), lambda i, k: (i, k)),
                  pl.BlockSpec((tk, N), lambda i, k: (k, 0)),
                  pl.BlockSpec((1, N), lambda i, k: (0, 0)),
                  pl.BlockSpec((tm, N), lambda i, k: (i, 0)),
                  pl.BlockSpec((1, N), lambda i, k: (0, 0)),
                  pl.BlockSpec((1, N), lambda i, k: (0, 0))],
        out_specs=pl.BlockSpec((tm, N), lambda i, k: (i, 0)),
        scratch_shapes=[pltpu.VMEM((tm, N), jnp.float32)],
        compiler_params=pltpu.CompilerParams(
            dimension_semantics=("parallel", "arbitrary"),
            vmem_limit_bytes=vmem),
        cost_estimate=pl.CostEstimate(
            flops=2 * M * N * K, transcendentals=0,
            bytes_accessed=int(_nbytes((M, K), x.dtype)
                               + (M // tm) * _nbytes((K, N), w.dtype)
                               + _nbytes((M, N), resid.dtype)
                               + _nbytes((M, N), out_dtype))),
    )(x, w, b.astype(jnp.float32).reshape(1, N), resid,
      gamma.reshape(1, N), beta.reshape(1, N))


# ------- kernel C: FF1(GELU) + FF2 + bias + residual + LayerNorm fused --------

def _ffn_block_kernel(x_ref, w1_ref, b1_ref, w2_ref, b2_ref, g_ref, be_ref,
                      o_ref, acc_ref, *, eps):
    f = pl.program_id(1)

    @pl.when(f == 0)
    def _():
        acc_ref[...] = jnp.zeros_like(acc_ref)

    # (tm, tf) intermediate lives only in VMEM/vregs — never in HBM.
    h1 = jnp.dot(x_ref[...], w1_ref[...],
                 preferred_element_type=jnp.float32) + b1_ref[...]
    h1 = _gelu(h1)
    acc_ref[...] += jnp.dot(h1.astype(w2_ref.dtype), w2_ref[...],
                            preferred_element_type=jnp.float32)

    @pl.when(f == pl.num_programs(1) - 1)
    def _():
        h = acc_ref[...] + b2_ref[...] + x_ref[...].astype(jnp.float32)
        o_ref[...] = _layernorm(h, g_ref[...], be_ref[...], eps).astype(o_ref.dtype)


def ffn_block(x, w1, b1, w2, b2, gamma, beta, eps=1e-5, out_dtype=jnp.float32):
    """LayerNorm(x + (gelu(x @ w1 + b1) @ w2 + b2)) in one pallas_call."""
    M, D = x.shape
    F = w1.shape[1]
    tm = _pick_tile(M, _TM, 8)
    tf = _pick_tile(F, _TF, 128)
    grid = (M // tm, F // tf)
    vmem = _vmem_limit([((tm, D), x.dtype), ((D, tf), w1.dtype),
                        ((1, tf), jnp.float32), ((tf, D), w2.dtype),
                        ((1, D), jnp.float32), ((1, D), jnp.float32),
                        ((1, D), jnp.float32), ((tm, D), out_dtype)],
                       scratch=[((tm, D), jnp.float32)])
    return pl.pallas_call(
        partial(_ffn_block_kernel, eps=eps),
        out_shape=jax.ShapeDtypeStruct((M, D), out_dtype),
        grid=grid,
        in_specs=[pl.BlockSpec((tm, D), lambda i, f: (i, 0)),
                  pl.BlockSpec((D, tf), lambda i, f: (0, f)),
                  pl.BlockSpec((1, tf), lambda i, f: (0, f)),
                  pl.BlockSpec((tf, D), lambda i, f: (f, 0)),
                  pl.BlockSpec((1, D), lambda i, f: (0, 0)),
                  pl.BlockSpec((1, D), lambda i, f: (0, 0)),
                  pl.BlockSpec((1, D), lambda i, f: (0, 0))],
        out_specs=pl.BlockSpec((tm, D), lambda i, f: (i, 0)),
        scratch_shapes=[pltpu.VMEM((tm, D), jnp.float32)],
        compiler_params=pltpu.CompilerParams(
            dimension_semantics=("parallel", "arbitrary"),
            vmem_limit_bytes=vmem),
        cost_estimate=pl.CostEstimate(
            flops=4 * M * D * F, transcendentals=M * F,
            bytes_accessed=int(_nbytes((M, D), x.dtype)
                               + (M // tm) * (_nbytes((D, F), w1.dtype)
                                              + _nbytes((F, D), w2.dtype))
                               + _nbytes((M, D), out_dtype))),
    )(x, w1, b1.astype(jnp.float32).reshape(1, F), w2,
      b2.astype(jnp.float32).reshape(1, D),
      gamma.reshape(1, D), beta.reshape(1, D))


# ------- kernel D: head-major flash attention, grid = (B, H, Sq, Skv) ---------

def _mha_flash_kernel(q_ref, k_ref, v_ref, o_ref, m_sc, l_sc, acc_sc, *, scale):
    ki = pl.program_id(3)

    @pl.when(ki == 0)
    def _():
        m_sc[...] = jnp.full_like(m_sc, -jnp.inf)
        l_sc[...] = jnp.zeros_like(l_sc)
        acc_sc[...] = jnp.zeros_like(acc_sc)

    # fold the 1/sqrt(dh) scale into q (f32 mul, then cast for the MXU)
    q = (q_ref[0, 0].astype(jnp.float32) * scale).astype(k_ref.dtype)
    s = jax.lax.dot_general(q, k_ref[0, 0], (((1,), (1,)), ((), ())),
                            preferred_element_type=jnp.float32)      # (tq, tkv)

    m_prev = m_sc[...]
    m_new = jnp.maximum(m_prev, jnp.max(s, axis=-1, keepdims=True))
    alpha = jnp.exp(m_prev - m_new)
    p = jnp.exp(s - m_new)
    l_sc[...] = alpha * l_sc[...] + jnp.sum(p, axis=-1, keepdims=True)
    acc_sc[...] = alpha * acc_sc[...] + jnp.dot(
        p.astype(v_ref.dtype), v_ref[0, 0], preferred_element_type=jnp.float32)
    m_sc[...] = m_new

    @pl.when(ki == pl.num_programs(3) - 1)
    def _():
        # exact division (matches torch softmax more closely than approx recip)
        o_ref[0, 0] = (acc_sc[...] / l_sc[...]).astype(o_ref.dtype)


def multihead_self_attention(qkv, batch, seq, nhead, out_dtype=jnp.float32):
    """qkv: (B*S, 3*d_model) packed projection -> (B*S, d_model)."""
    d3 = qkv.shape[-1]
    d_model = d3 // 3
    dh = d_model // nhead

    # Head-major (B, nhead, S, dh) q/k/v slabs: one fused XLA transpose here
    # replaces all in-kernel per-head lane slicing / concatenation.
    qkv5 = qkv.reshape(batch, seq, 3, nhead, dh).transpose(2, 0, 3, 1, 4)
    q, k, v = qkv5[0], qkv5[1], qkv5[2]

    tq = _pick_tile(seq, _TQ, 8)
    tkv = _pick_tile(seq, _TKV, 8)
    grid = (batch, nhead, seq // tq, seq // tkv)

    vmem = _vmem_limit(
        [((1, 1, tq, dh), q.dtype), ((1, 1, tkv, dh), k.dtype),
         ((1, 1, tkv, dh), v.dtype), ((1, 1, tq, dh), out_dtype)],
        scratch=[((tq, 128), jnp.float32), ((tq, 128), jnp.float32),
                 ((tq, max(dh, 128)), jnp.float32), ((tq, tkv), jnp.float32)])

    out = pl.pallas_call(
        partial(_mha_flash_kernel, scale=1.0 / math.sqrt(dh)),
        out_shape=jax.ShapeDtypeStruct((batch, nhead, seq, dh), out_dtype),
        grid=grid,
        in_specs=[pl.BlockSpec((1, 1, tq, dh), lambda b, h, qi, ki: (b, h, qi, 0)),
                  pl.BlockSpec((1, 1, tkv, dh), lambda b, h, qi, ki: (b, h, ki, 0)),
                  pl.BlockSpec((1, 1, tkv, dh), lambda b, h, qi, ki: (b, h, ki, 0))],
        out_specs=pl.BlockSpec((1, 1, tq, dh), lambda b, h, qi, ki: (b, h, qi, 0)),
        scratch_shapes=[pltpu.VMEM((tq, 1), jnp.float32),
                        pltpu.VMEM((tq, 1), jnp.float32),
                        pltpu.VMEM((tq, dh), jnp.float32)],
        compiler_params=pltpu.CompilerParams(
            dimension_semantics=("parallel", "parallel", "parallel", "arbitrary"),
            vmem_limit_bytes=vmem),
        cost_estimate=pl.CostEstimate(
            flops=4 * batch * nhead * seq * seq * dh,
            transcendentals=2 * batch * nhead * seq * seq,
            bytes_accessed=int(4 * _nbytes((batch, nhead, seq, dh), q.dtype))),
    )(q, k, v)

    # back to token-major (B*S, d_model) for the out_proj matmul
    return out.transpose(0, 2, 1, 3).reshape(batch * seq, d_model)


# ------------------------------ model forward ---------------------------------

def transformer_encoder_forward(params, x, *, nhead):
    """Forward matching the PyTorch TransformerEncoder module (eval mode)."""
    S, B, _ = x.shape
    d_model = params["emb_w"].shape[1]
    act_dtype = params["emb_w"].dtype     # bf16 weights -> bf16 activations at rest

    # B-major token layout: each batch element's sequence is contiguous.
    tok = x.transpose(1, 0, 2).reshape(B * S, -1).astype(act_dtype)

    # self.embedding
    h = linear(tok, params["emb_w"], params["emb_b"], out_dtype=act_dtype)

    # self.transformer — post-LN encoder layers (norm_first=False, gelu)
    for layer in params["layers"]:
        qkv = linear(h, layer["in_proj_w"], layer["in_proj_b"], out_dtype=act_dtype)
        attn = multihead_self_attention(qkv, B, S, nhead, out_dtype=act_dtype)
        # dropout -> identity (eval); out_proj + residual + norm1 fused
        h = linear_residual_layernorm(attn, layer["out_proj_w"],
                                      layer["out_proj_b"], h,
                                      layer["ln1_g"], layer["ln1_b"],
                                      out_dtype=act_dtype)
        # feed-forward block fully fused (FF1 + gelu + FF2 + residual + norm2)
        h = ffn_block(h, layer["ff1_w"], layer["ff1_b"],
                      layer["ff2_w"], layer["ff2_b"],
                      layer["ln2_g"], layer["ln2_b"], out_dtype=act_dtype)

    # self.fc, then self.dropout (identity at inference)
    out = linear(h, params["fc_w"], params["fc_b"], out_dtype=jnp.float32)
    return out.reshape(B, S, d_model).transpose(1, 0, 2)


def prepare_params(params, compute_dtype=jnp.float32):
    """Cast matmul weights (and hence HBM-resident activations) to compute_dtype
    once, outside the kernels.  Biases / LayerNorm params and all accumulation /
    softmax / GELU / LayerNorm math stay f32 (v5e VPU/EUP have no bf16 path)."""
    def cast(name, v):
        return v.astype(compute_dtype) if name.endswith("_w") else v
    out = {k: (v if k == "layers" else cast(k, v)) for k, v in params.items()}
    out["layers"] = [{k: cast(k, v) for k, v in layer.items()}
                     for layer in params["layers"]]
    return out


# --------------------------- deterministic init --------------------------------

def init_params(key, input_dim, d_model, num_layers, dim_feedforward):
    def dense(k, fan_in, fan_out):
        kw, kb = jax.random.split(k)
        bound = 1.0 / math.sqrt(fan_in)
        w = jax.random.uniform(kw, (fan_in, fan_out), jnp.float32, -bound, bound)
        b = jax.random.uniform(kb, (fan_out,), jnp.float32, -bound, bound)
        return w, b

    keys = jax.random.split(key, num_layers + 2)
    emb_w, emb_b = dense(keys[0], input_dim, d_model)
    layers = []
    for l in range(num_layers):
        ks = jax.random.split(keys[1 + l], 4)
        in_w, in_b = dense(ks[0], d_model, 3 * d_model)     # MHA in_proj (q|k|v)
        out_w, out_b = dense(ks[1], d_model, d_model)       # MHA out_proj
        f1w, f1b = dense(ks[2], d_model, dim_feedforward)   # linear1
        f2w, f2b = dense(ks[3], dim_feedforward, d_model)   # linear2
        layers.append(dict(
            in_proj_w=in_w, in_proj_b=in_b,
            out_proj_w=out_w, out_proj_b=out_b,
            ff1_w=f1w, ff1_b=f1b, ff2_w=f2w, ff2_b=f2b,
            ln1_g=jnp.ones((d_model,), jnp.float32),
            ln1_b=jnp.zeros((d_model,), jnp.float32),
            ln2_g=jnp.ones((d_model,), jnp.float32),
            ln2_b=jnp.zeros((d_model,), jnp.float32)))
    fc_w, fc_b = dense(keys[-1], d_model, d_model)
    return dict(emb_w=emb_w, emb_b=emb_b, layers=layers, fc_w=fc_w, fc_b=fc_b)


# ------------------------ pure-JAX reference (correctness) ---------------------

def _ref_forward(params, x, nhead):
    S, B, _ = x.shape
    d_model = params["emb_w"].shape[1]
    dh = d_model // nhead

    def ln(t, g, b, eps=1e-5):
        mu = t.mean(-1, keepdims=True)
        var = ((t - mu) ** 2).mean(-1, keepdims=True)
        return (t - mu) / jnp.sqrt(var + eps) * g + b

    h = x @ params["emb_w"] + params["emb_b"]                      # (S, B, d)
    for layer in params["layers"]:
        qkv = h @ layer["in_proj_w"] + layer["in_proj_b"]
        q, k, v = jnp.split(qkv, 3, axis=-1)
        def heads(t):
            return t.reshape(S, B, nhead, dh).transpose(1, 2, 0, 3)
        qh, kh, vh = heads(q), heads(k), heads(v)
        s = jnp.einsum("bhqd,bhkd->bhqk", qh, kh) / math.sqrt(dh)
        p = jax.nn.softmax(s, axis=-1)
        o = jnp.einsum("bhqk,bhkd->bhqd", p, vh)
        o = o.transpose(2, 0, 1, 3).reshape(S, B, d_model)
        attn = o @ layer["out_proj_w"] + layer["out_proj_b"]
        h = ln(h + attn, layer["ln1_g"], layer["ln1_b"])
        ff = jax.nn.gelu(h @ layer["ff1_w"] + layer["ff1_b"], approximate=False)
        ff = ff @ layer["ff2_w"] + layer["ff2_b"]
        h = ln(h + ff, layer["ln2_g"], layer["ln2_b"])
    return h @ params["fc_w"] + params["fc_b"]


# ----------------------------------- main --------------------------------------

if __name__ == "__main__":
    S, B = 8, 2
    input_dim, d_model, nhead, num_layers, dim_ff = 16, 32, 4, 2, 64

    key = jax.random.PRNGKey(0)
    k_param, k_x = jax.random.split(key)
    params = init_params(k_param, input_dim, d_model, num_layers, dim_ff)
    x = jax.random.normal(k_x, (S, B, input_dim), jnp.float32)

    # prepare_params(params, jnp.bfloat16) enables the bf16-at-rest MXU path on
    # v6e/v7x; default f32 tracks the PyTorch reference closely.
    params_rt = prepare_params(params, jnp.float32)

    fwd = jax.jit(partial(transformer_encoder_forward, nhead=nhead))
    out = jax.block_until_ready(fwd(params_rt, x))

    assert out.shape == (S, B, d_model), out.shape
    assert bool(jnp.all(jnp.isfinite(out)))

    with jax.default_matmul_precision("highest"):
        ref = jax.jit(partial(_ref_forward, nhead=nhead))(params, x)
    err = float(jnp.max(jnp.abs(out - ref)))
    assert err < 5e-3, f"max abs err vs reference: {err}"

    print("KERNEL_OK")
</pallas_src>

<mosaic_0001>
module attributes {stable_mosaic.version = 11 : i64} {
  func.func @_linear_kernel(%arg0: i32, %arg1: i32, %arg2: i32, %arg3: memref<16x32xf32, #tpu.memory_space<vmem>>, %arg4: memref<32x96xf32, #tpu.memory_space<vmem>>, %arg5: memref<1x96xf32, #tpu.memory_space<vmem>>, %arg6: memref<16x96xf32, #tpu.memory_space<vmem>>, %arg7: memref<16x96xf32, #tpu.memory_space<vmem>>) attributes {dimension_semantics = [#tpu.dimension_semantics<parallel>, #tpu.dimension_semantics<parallel>, #tpu.dimension_semantics<arbitrary>], iteration_bounds = array<i64: 1, 1, 1>, scalar_prefetch = 0 : i64, scratch_operands = 1 : i64, tpu.core_type = #tpu.core_type<tc>, window_params = [{transform_indices = @transform_0, window_bounds = array<i64: 16, 32>}, {transform_indices = @transform_1, window_bounds = array<i64: 32, 96>}, {transform_indices = @transform_2, window_bounds = array<i64: 1, 96>}, {transform_indices = @transform_3, window_bounds = array<i64: 16, 96>}]} {
    %c0_i32 = arith.constant 0 : i32
    %0 = arith.cmpi eq, %arg2, %c0_i32 : i32
    %1 = arith.extui %0 : i1 to i32
    %c0_i32_0 = arith.constant 0 : i32
    %2 = arith.cmpi ne, %1, %c0_i32_0 : i32
    scf.if %2 {
      %cst_10 = arith.constant 0.000000e+00 : f32
      %12 = vector.broadcast %cst_10 : f32 to vector<16x96xf32>
      %c0_11 = arith.constant 0 : index
      %c0_12 = arith.constant 0 : index
      %13 = vector.load %arg7[%c0_11, %c0_12] : memref<16x96xf32, #tpu.memory_space<vmem>>, vector<16x96xf32>
      tpu.vector_store %arg7[%c0_11, %c0_12], %12 {strides = array<i32>} : memref<16x96xf32, #tpu.memory_space<vmem>>, vector<16x96xf32>,
    } else {
    }
    %c0 = arith.constant 0 : index
    %c0_1 = arith.constant 0 : index
    %3 = vector.load %arg7[%c0, %c0_1] : memref<16x96xf32, #tpu.memory_space<vmem>>, vector<16x96xf32>
    %c0_2 = arith.constant 0 : index
    %c0_3 = arith.constant 0 : index
    %4 = vector.load %arg3[%c0_2, %c0_3] : memref<16x32xf32, #tpu.memory_space<vmem>>, vector<16x32xf32>
    %c0_4 = arith.constant 0 : index
    %c0_5 = arith.constant 0 : index
    %5 = vector.load %arg4[%c0_4, %c0_5] : memref<32x96xf32, #tpu.memory_space<vmem>>, vector<32x96xf32>
    %cst = arith.constant dense<0.000000e+00> : vector<16x96xf32>
    %6 = tpu.matmul %4, %5, %cst {dimension_numbers = #tpu.dot_dimension_numbers<[1], [0], [0], [1], [0, 0, 1, 1], [], []>} : vector<16x32xf32>, vector<32x96xf32>, vector<16x96xf32> -> vector<16x96xf32>
    %7 = arith.addf %3, %6 : vector<16x96xf32>
    %c0_6 = arith.constant 0 : index
    %c0_7 = arith.constant 0 : index
    %8 = vector.load %arg7[%c0_6, %c0_7] : memref<16x96xf32, #tpu.memory_space<vmem>>, vector<16x96xf32>
    tpu.vector_store %arg7[%c0_6, %c0_7], %7 {strides = array<i32>} : memref<16x96xf32, #tpu.memory_space<vmem>>, vector<16x96xf32>,
    %c0_i32_8 = arith.constant 0 : i32
    %9 = arith.cmpi eq, %arg2, %c0_i32_8 : i32
    %10 = arith.extui %9 : i1 to i32
    %c0_i32_9 = arith.constant 0 : i32
    %11 = arith.cmpi ne, %10, %c0_i32_9 : i32
    scf.if %11 {
      %c0_10 = arith.constant 0 : index
      %c0_11 = arith.constant 0 : index
      %12 = vector.load %arg7[%c0_10, %c0_11] : memref<16x96xf32, #tpu.memory_space<vmem>>, vector<16x96xf32>
      %c0_12 = arith.constant 0 : index
      %c0_13 = arith.constant 0 : index
      %13 = vector.load %arg5[%c0_12, %c0_13] : memref<1x96xf32, #tpu.memory_space<vmem>>, vector<1x96xf32>
      %14 = vector.broadcast %13 : vector<1x96xf32> to vector<16x96xf32>
      %15 = arith.addf %12, %14 : vector<16x96xf32>
      %c0_14 = arith.constant 0 : index
      %c0_15 = arith.constant 0 : index
      %16 = vector.load %arg6[%c0_14, %c0_15] : memref<16x96xf32, #tpu.memory_space<vmem>>, vector<16x96xf32>
      tpu.vector_store %arg6[%c0_14, %c0_15], %15 {strides = array<i32>} : memref<16x96xf32, #tpu.memory_space<vmem>>, vector<16x96xf32>,
    } else {
    }
    return
  }
  func.func @transform_0(%arg0: i32, %arg1: i32, %arg2: i32) -> (i32, i32) {
    %c0_i32 = arith.constant 0 : i32
    return %arg0, %arg2 : i32, i32
  }
  func.func @transform_1(%arg0: i32, %arg1: i32, %arg2: i32) -> (i32, i32) {
    %c0_i32 = arith.constant 0 : i32
    return %arg2, %arg1 : i32, i32
  }
  func.func @transform_2(%arg0: i32, %arg1: i32, %arg2: i32) -> (i32, i32) {
    %c0_i32 = arith.constant 0 : i32
    %c0_i32_0 = arith.constant 0 : i32
    return %c0_i32, %arg1 : i32, i32
  }
  func.func @transform_3(%arg0: i32, %arg1: i32, %arg2: i32) -> (i32, i32) {
    %c0_i32 = arith.constant 0 : i32
    return %arg0, %arg1 : i32, i32
  }
}

module attributes {stable_mosaic.version = 11 : i64} {
  func.func @_linear_kernel(%arg0: i32, %arg1: i32, %arg2: i32, %arg3: memref<16x16xf32, #tpu.memory_space<vmem>>, %arg4: memref<16x32xf32, #tpu.memory_space<vmem>>, %arg5: memref<1x32xf32, #tpu.memory_space<vmem>>, %arg6: memref<16x32xf32, #tpu.memory_space<vmem>>, %arg7: memref<16x32xf32, #tpu.memory_space<vmem>>) attributes {dimension_semantics = [#tpu.dimension_semantics<parallel>, #tpu.dimension_semantics<parallel>, #tpu.dimension_semantics<arbitrary>], iteration_bounds = array<i64: 1, 1, 1>, scalar_prefetch = 0 : i64, scratch_operands = 1 : i64, tpu.core_type = #tpu.core_type<tc>, window_params = [{transform_indices = @transform_0, window_bounds = array<i64: 16, 16>}, {transform_indices = @transform_1, window_bounds = array<i64: 16, 32>}, {transform_indices = @transform_2, window_bounds = array<i64: 1, 32>}, {transform_indices = @transform_3, window_bounds = array<i64: 16, 32>}]} {
    %c0_i32 = arith.constant 0 : i32
    %0 = arith.cmpi eq, %arg2, %c0_i32 : i32
    %1 = arith.extui %0 : i1 to i32
    %c0_i32_0 = arith.constant 0 : i32
    %2 = arith.cmpi ne, %1, %c0_i32_0 : i32
    scf.if %2 {
      %cst_10 = arith.constant 0.000000e+00 : f32
      %12 = vector.broadcast %cst_10 : f32 to vector<16x32xf32>
      %c0_11 = arith.constant 0 : index
      %c0_12 = arith.constant 0 : index
      %13 = vector.load %arg7[%c0_11, %c0_12] : memref<16x32xf32, #tpu.memory_space<vmem>>, vector<16x32xf32>
      tpu.vector_store %arg7[%c0_11, %c0_12], %12 {strides = array<i32>} : memref<16x32xf32, #tpu.memory_space<vmem>>, vector<16x32xf32>,
    } else {
    }
    %c0 = arith.constant 0 : index
    %c0_1 = arith.constant 0 : index
    %3 = vector.load %arg7[%c0, %c0_1] : memref<16x32xf32, #tpu.memory_space<vmem>>, vector<16x32xf32>
    %c0_2 = arith.constant 0 : index
    %c0_3 = arith.constant 0 : index
    %4 = vector.load %arg3[%c0_2, %c0_3] : memref<16x16xf32, #tpu.memory_space<vmem>>, vector<16x16xf32>
    %c0_4 = arith.constant 0 : index
    %c0_5 = arith.constant 0 : index
    %5 = vector.load %arg4[%c0_4, %c0_5] : memref<16x32xf32, #tpu.memory_space<vmem>>, vector<16x32xf32>
    %cst = arith.constant dense<0.000000e+00> : vector<16x32xf32>
    %6 = tpu.matmul %4, %5, %cst {dimension_numbers = #tpu.dot_dimension_numbers<[1], [0], [0], [1], [0, 0, 1, 1], [], []>} : vector<16x16xf32>, vector<16x32xf32>, vector<16x32xf32> -> vector<16x32xf32>
    %7 = arith.addf %3, %6 : vector<16x32xf32>
    %c0_6 = arith.constant 0 : index
    %c0_7 = arith.constant 0 : index
    %8 = vector.load %arg7[%c0_6, %c0_7] : memref<16x32xf32, #tpu.memory_space<vmem>>, vector<16x32xf32>
    tpu.vector_store %arg7[%c0_6, %c0_7], %7 {strides = array<i32>} : memref<16x32xf32, #tpu.memory_space<vmem>>, vector<16x32xf32>,
    %c0_i32_8 = arith.constant 0 : i32
    %9 = arith.cmpi eq, %arg2, %c0_i32_8 : i32
    %10 = arith.extui %9 : i1 to i32
    %c0_i32_9 = arith.constant 0 : i32
    %11 = arith.cmpi ne, %10, %c0_i32_9 : i32
    scf.if %11 {
      %c0_10 = arith.constant 0 : index
      %c0_11 = arith.constant 0 : index
      %12 = vector.load %arg7[%c0_10, %c0_11] : memref<16x32xf32, #tpu.memory_space<vmem>>, vector<16x32xf32>
      %c0_12 = arith.constant 0 : index
      %c0_13 = arith.constant 0 : index
      %13 = vector.load %arg5[%c0_12, %c0_13] : memref<1x32xf32, #tpu.memory_space<vmem>>, vector<1x32xf32>
      %14 = vector.broadcast %13 : vector<1x32xf32> to vector<16x32xf32>
      %15 = arith.addf %12, %14 : vector<16x32xf32>
      %c0_14 = arith.constant 0 : index
      %c0_15 = arith.constant 0 : index
      %16 = vector.load %arg6[%c0_14, %c0_15] : memref<16x32xf32, #tpu.memory_space<vmem>>, vector<16x32xf32>
      tpu.vector_store %arg6[%c0_14, %c0_15], %15 {strides = array<i32>} : memref<16x32xf32, #tpu.memory_space<vmem>>, vector<16x32xf32>,
    } else {
    }
    return
  }
  func.func @transform_0(%arg0: i32, %arg1: i32, %arg2: i32) -> (i32, i32) {
    %c0_i32 = arith.constant 0 : i32
    return %arg0, %arg2 : i32, i32
  }
  func.func @transform_1(%arg0: i32, %arg1: i32, %arg2: i32) -> (i32, i32) {
    %c0_i32 = arith.constant 0 : i32
    return %arg2, %arg1 : i32, i32
  }
  func.func @transform_2(%arg0: i32, %arg1: i32, %arg2: i32) -> (i32, i32) {
    %c0_i32 = arith.constant 0 : i32
    %c0_i32_0 = arith.constant 0 : i32
    return %c0_i32, %arg1 : i32, i32
  }
  func.func @transform_3(%arg0: i32, %arg1: i32, %arg2: i32) -> (i32, i32) {
    %c0_i32 = arith.constant 0 : i32
    return %arg0, %arg1 : i32, i32
  }
}

module attributes {stable_mosaic.version = 11 : i64} {
  func.func @_linear_resid_ln_kernel(%arg0: i32, %arg1: i32, %arg2: memref<16x32xf32, #tpu.memory_space<vmem>>, %arg3: memref<32x32xf32, #tpu.memory_space<vmem>>, %arg4: memref<1x32xf32, #tpu.memory_space<vmem>>, %arg5: memref<16x32xf32, #tpu.memory_space<vmem>>, %arg6: memref<1x32xf32, #tpu.memory_space<vmem>>, %arg7: memref<1x32xf32, #tpu.memory_space<vmem>>, %arg8: memref<16x32xf32, #tpu.memory_space<vmem>>, %arg9: memref<16x32xf32, #tpu.memory_space<vmem>>) attributes {dimension_semantics = [#tpu.dimension_semantics<parallel>, #tpu.dimension_semantics<arbitrary>], iteration_bounds = array<i64: 1, 1>, scalar_prefetch = 0 : i64, scratch_operands = 1 : i64, tpu.core_type = #tpu.core_type<tc>, window_params = [{transform_indices = @transform_0, window_bounds = array<i64: 16, 32>}, {transform_indices = @transform_1, window_bounds = array<i64: 32, 32>}, {pipeline_mode = #tpu.pipeline_mode<synchronous>, transform_indices = @transform_2, window_bounds = array<i64: 1, 32>}, {transform_indices = @transform_3, window_bounds = array<i64: 16, 32>}, {pipeline_mode = #tpu.pipeline_mode<synchronous>, transform_indices = @transform_4, window_bounds = array<i64: 1, 32>}, {pipeline_mode = #tpu.pipeline_mode<synchronous>, transform_indices = @transform_5, window_bounds = array<i64: 1, 32>}, {transform_indices = @transform_6, window_bounds = array<i64: 16, 32>}]} {
    %c0_i32 = arith.constant 0 : i32
    %0 = arith.cmpi eq, %arg1, %c0_i32 : i32
    %1 = arith.extui %0 : i1 to i32
    %c0_i32_0 = arith.constant 0 : i32
    %2 = arith.cmpi ne, %1, %c0_i32_0 : i32
    scf.if %2 {
      %cst_10 = arith.constant 0.000000e+00 : f32
      %12 = vector.broadcast %cst_10 : f32 to vector<16x32xf32>
      %c0_11 = arith.constant 0 : index
      %c0_12 = arith.constant 0 : index
      %13 = vector.load %arg9[%c0_11, %c0_12] : memref<16x32xf32, #tpu.memory_space<vmem>>, vector<16x32xf32>
      tpu.vector_store %arg9[%c0_11, %c0_12], %12 {strides = array<i32>} : memref<16x32xf32, #tpu.memory_space<vmem>>, vector<16x32xf32>,
    } else {
    }
    %c0 = arith.constant 0 : index
    %c0_1 = arith.constant 0 : index
    %3 = vector.load %arg9[%c0, %c0_1] : memref<16x32xf32, #tpu.memory_space<vmem>>, vector<16x32xf32>
    %c0_2 = arith.constant 0 : index
    %c0_3 = arith.constant 0 : index
    %4 = vector.load %arg2[%c0_2, %c0_3] : memref<16x32xf32, #tpu.memory_space<vmem>>, vector<16x32xf32>
    %c0_4 = arith.constant 0 : index
    %c0_5 = arith.constant 0 : index
    %5 = vector.load %arg3[%c0_4, %c0_5] : memref<32x32xf32, #tpu.memory_space<vmem>>, vector<32x32xf32>
    %cst = arith.constant dense<0.000000e+00> : vector<16x32xf32>
    %6 = tpu.matmul %4, %5, %cst {dimension_numbers = #tpu.dot_dimension_numbers<[1], [0], [0], [1], [0, 0, 1, 1], [], []>} : vector<16x32xf32>, vector<32x32xf32>, vector<16x32xf32> -> vector<16x32xf32>
    %7 = arith.addf %3, %6 : vector<16x32xf32>
    %c0_6 = arith.constant 0 : index
    %c0_7 = arith.constant 0 : index
    %8 = vector.load %arg9[%c0_6, %c0_7] : memref<16x32xf32, #tpu.memory_space<vmem>>, vector<16x32xf32>
    tpu.vector_store %arg9[%c0_6, %c0_7], %7 {strides = array<i32>} : memref<16x32xf32, #tpu.memory_space<vmem>>, vector<16x32xf32>,
    %c0_i32_8 = arith.constant 0 : i32
    %9 = arith.cmpi eq, %arg1, %c0_i32_8 : i32
    %10 = arith.extui %9 : i1 to i32
    %c0_i32_9 = arith.constant 0 : i32
    %11 = arith.cmpi ne, %10, %c0_i32_9 : i32
    scf.if %11 {
      %c0_10 = arith.constant 0 : index
      %c0_11 = arith.constant 0 : index
      %12 = vector.load %arg9[%c0_10, %c0_11] : memref<16x32xf32, #tpu.memory_space<vmem>>, vector<16x32xf32>
      %c0_12 = arith.constant 0 : index
      %c0_13 = arith.constant 0 : index
      %13 = vector.load %arg4[%c0_12, %c0_13] : memref<1x32xf32, #tpu.memory_space<vmem>>, vector<1x32xf32>
      %14 = vector.broadcast %13 : vector<1x32xf32> to vector<16x32xf32>
      %15 = arith.addf %12, %14 : vector<16x32xf32>
      %c0_14 = arith.constant 0 : index
      %c0_15 = arith.constant 0 : index
      %16 = vector.load %arg5[%c0_14, %c0_15] : memref<16x32xf32, #tpu.memory_space<vmem>>, vector<16x32xf32>
      %17 = arith.addf %15, %16 : vector<16x32xf32>
      %c0_16 = arith.constant 0 : index
      %c0_17 = arith.constant 0 : index
      %18 = vector.load %arg6[%c0_16, %c0_17] : memref<1x32xf32, #tpu.memory_space<vmem>>, vector<1x32xf32>
      %c0_18 = arith.constant 0 : index
      %c0_19 = arith.constant 0 : index
      %19 = vector.load %arg7[%c0_18, %c0_19] : memref<1x32xf32, #tpu.memory_space<vmem>>, vector<1x32xf32>
      %cst_20 = arith.constant dense<0.000000e+00> : vector<16xf32>
      %20 = vector.multi_reduction <add>, %17, %cst_20 [1] : vector<16x32xf32> to vector<16xf32>
      %21 = vector.shape_cast %20 : vector<16xf32> to vector<16x1xf32>
      %cst_21 = arith.constant 3.200000e+01 : f32
      %22 = vector.broadcast %cst_21 : f32 to vector<16x1xf32>
      %23 = arith.divf %21, %22 : vector<16x1xf32>
      %24 = vector.broadcast %23 : vector<16x1xf32> to vector<16x32xf32>
      %25 = arith.subf %17, %24 : vector<16x32xf32>
      %26 = arith.mulf %25, %25 : vector<16x32xf32>
      %cst_22 = arith.constant dense<0.000000e+00> : vector<16xf32>
      %27 = vector.multi_reduction <add>, %26, %cst_22 [1] : vector<16x32xf32> to vector<16xf32>
      %28 = vector.shape_cast %27 : vector<16xf32> to vector<16x1xf32>
      %cst_23 = arith.constant 3.200000e+01 : f32
      %29 = vector.broadcast %cst_23 : f32 to vector<16x1xf32>
      %30 = arith.divf %28, %29 : vector<16x1xf32>
      %31 = vector.broadcast %23 : vector<16x1xf32> to vector<16x32xf32>
      %32 = arith.subf %17, %31 : vector<16x32xf32>
      %cst_24 = arith.constant 9.99999974E-6 : f32
      %33 = vector.broadcast %cst_24 : f32 to vector<16x1xf32>
      %34 = arith.addf %30, %33 : vector<16x1xf32>
      %35 = math.rsqrt %34 : vector<16x1xf32>
      %36 = vector.broadcast %35 : vector<16x1xf32> to vector<16x32xf32>
      %37 = arith.mulf %32, %36 : vector<16x32xf32>
      %38 = vector.broadcast %18 : vector<1x32xf32> to vector<16x32xf32>
      %39 = arith.mulf %37, %38 : vector<16x32xf32>
      %40 = vector.broadcast %19 : vector<1x32xf32> to vector<16x32xf32>
      %41 = arith.addf %39, %40 : vector<16x32xf32>
      %c0_25 = arith.constant 0 : index
      %c0_26 = arith.constant 0 : index
      %42 = vector.load %arg8[%c0_25, %c0_26] : memref<16x32xf32, #tpu.memory_space<vmem>>, vector<16x32xf32>
      tpu.vector_store %arg8[%c0_25, %c0_26], %41 {strides = array<i32>} : memref<16x32xf32, #tpu.memory_space<vmem>>, vector<16x32xf32>,
    } else {
    }
    return
  }
  func.func @transform_0(%arg0: i32, %arg1: i32) -> (i32, i32) {
    %c0_i32 = arith.constant 0 : i32
    return %arg0, %arg1 : i32, i32
  }
  func.func @transform_1(%arg0: i32, %arg1: i32) -> (i32, i32) {
    %c0_i32 = arith.constant 0 : i32
    %c0_i32_0 = arith.constant 0 : i32
    return %arg1, %c0_i32 : i32, i32
  }
  func.func @transform_2(%arg0: i32, %arg1: i32) -> (i32, i32) {
    %c0_i32 = arith.constant 0 : i32
    %c0_i32_0 = arith.constant 0 : i32
    %c0_i32_1 = arith.constant 0 : i32
    return %c0_i32, %c0_i32_0 : i32, i32
  }
  func.func @transform_3(%arg0: i32, %arg1: i32) -> (i32, i32) {
    %c0_i32 = arith.constant 0 : i32
    %c0_i32_0 = arith.constant 0 : i32
    return %arg0, %c0_i32 : i32, i32
  }
  func.func @transform_4(%arg0: i32, %arg1: i32) -> (i32, i32) {
    %c0_i32 = arith.constant 0 : i32
    %c0_i32_0 = arith.constant 0 : i32
    %c0_i32_1 = arith.constant 0 : i32
    return %c0_i32, %c0_i32_0 : i32, i32
  }
  func.func @transform_5(%arg0: i32, %arg1: i32) -> (i32, i32) {
    %c0_i32 = arith.constant 0 : i32
    %c0_i32_0 = arith.constant 0 : i32
    %c0_i32_1 = arith.constant 0 : i32
    return %c0_i32, %c0_i32_0 : i32, i32
  }
  func.func @transform_6(%arg0: i32, %arg1: i32) -> (i32, i32) {
    %c0_i32 = arith.constant 0 : i32
    %c0_i32_0 = arith.constant 0 : i32
    return %arg0, %c0_i32 : i32, i32
  }
}

module attributes {stable_mosaic.version = 11 : i64} {
  func.func @_mha_flash_kernel(%arg0: i32, %arg1: i32, %arg2: i32, %arg3: i32, %arg4: memref<1x1x8x8xf32, #tpu.memory_space<vmem>>, %arg5: memref<1x1x8x8xf32, #tpu.memory_space<vmem>>, %arg6: memref<1x1x8x8xf32, #tpu.memory_space<vmem>>, %arg7: memref<1x1x8x8xf32, #tpu.memory_space<vmem>>, %arg8: memref<8x1xf32, #tpu.memory_space<vmem>>, %arg9: memref<8x1xf32, #tpu.memory_space<vmem>>, %arg10: memref<8x8xf32, #tpu.memory_space<vmem>>) attributes {dimension_semantics = [#tpu.dimension_semantics<parallel>, #tpu.dimension_semantics<parallel>, #tpu.dimension_semantics<parallel>, #tpu.dimension_semantics<arbitrary>], iteration_bounds = array<i64: 2, 4, 1, 1>, scalar_prefetch = 0 : i64, scratch_operands = 3 : i64, tpu.core_type = #tpu.core_type<tc>, window_params = [{transform_indices = @transform_0, window_bounds = array<i64: 1, 1, 8, 8>}, {transform_indices = @transform_1, window_bounds = array<i64: 1, 1, 8, 8>}, {transform_indices = @transform_2, window_bounds = array<i64: 1, 1, 8, 8>}, {transform_indices = @transform_3, window_bounds = array<i64: 1, 1, 8, 8>}]} {
    %c0_i32 = arith.constant 0 : i32
    %0 = arith.cmpi eq, %arg3, %c0_i32 : i32
    %1 = arith.extui %0 : i1 to i32
    %c0_i32_0 = arith.constant 0 : i32
    %2 = arith.cmpi ne, %1, %c0_i32_0 : i32
    scf.if %2 {
      %cst_30 = arith.constant 0xFF800000 : f32
      %37 = vector.broadcast %cst_30 : f32 to vector<8x1xf32>
      %c0_31 = arith.constant 0 : index
      %c0_32 = arith.constant 0 : index
      %38 = vector.load %arg8[%c0_31, %c0_32] : memref<8x1xf32, #tpu.memory_space<vmem>>, vector<8x1xf32>
      tpu.vector_store %arg8[%c0_31, %c0_32], %37 {strides = array<i32>} : memref<8x1xf32, #tpu.memory_space<vmem>>, vector<8x1xf32>,
      %cst_33 = arith.constant 0.000000e+00 : f32
      %39 = vector.broadcast %cst_33 : f32 to vector<8x1xf32>
      %c0_34 = arith.constant 0 : index
      %c0_35 = arith.constant 0 : index
      %40 = vector.load %arg9[%c0_34, %c0_35] : memref<8x1xf32, #tpu.memory_space<vmem>>, vector<8x1xf32>
      tpu.vector_store %arg9[%c0_34, %c0_35], %39 {strides = array<i32>} : memref<8x1xf32, #tpu.memory_space<vmem>>, vector<8x1xf32>,
      %cst_36 = arith.constant 0.000000e+00 : f32
      %41 = vector.broadcast %cst_36 : f32 to vector<8x8xf32>
      %c0_37 = arith.constant 0 : index
      %c0_38 = arith.constant 0 : index
      %42 = vector.load %arg10[%c0_37, %c0_38] : memref<8x8xf32, #tpu.memory_space<vmem>>, vector<8x8xf32>
      tpu.vector_store %arg10[%c0_37, %c0_38], %41 {strides = array<i32>} : memref<8x8xf32, #tpu.memory_space<vmem>>, vector<8x8xf32>,
    } else {
    }
    %c0 = arith.constant 0 : index
    %c0_1 = arith.constant 0 : index
    %c0_2 = arith.constant 0 : index
    %c0_3 = arith.constant 0 : index
    %3 = vector.load %arg4[%c0, %c0_1, %c0_2, %c0_3] : memref<1x1x8x8xf32, #tpu.memory_space<vmem>>, vector<1x1x8x8xf32>
    %4 = vector.shape_cast %3 : vector<1x1x8x8xf32> to vector<8x8xf32>
    %cst = arith.constant 0.353553385 : f32
    %5 = vector.broadcast %cst : f32 to vector<8x8xf32>
    %6 = arith.mulf %4, %5 : vector<8x8xf32>
    %c0_4 = arith.constant 0 : index
    %c0_5 = arith.constant 0 : index
    %c0_6 = arith.constant 0 : index
    %c0_7 = arith.constant 0 : index
    %7 = vector.load %arg5[%c0_4, %c0_5, %c0_6, %c0_7] : memref<1x1x8x8xf32, #tpu.memory_space<vmem>>, vector<1x1x8x8xf32>
    %8 = vector.shape_cast %7 : vector<1x1x8x8xf32> to vector<8x8xf32>
    %cst_8 = arith.constant dense<0.000000e+00> : vector<8x8xf32>
    %9 = tpu.matmul %6, %8, %cst_8 {dimension_numbers = #tpu.dot_dimension_numbers<[1], [1], [0], [0], [0, 0, 1, 0], [], []>} : vector<8x8xf32>, vector<8x8xf32>, vector<8x8xf32> -> vector<8x8xf32>
    %c0_9 = arith.constant 0 : index
    %c0_10 = arith.constant 0 : index
    %10 = vector.load %arg8[%c0_9, %c0_10] : memref<8x1xf32, #tpu.memory_space<vmem>>, vector<8x1xf32>
    %cst_11 = arith.constant dense<0xFF800000> : vector<8xf32>
    %11 = vector.multi_reduction <maximumf>, %9, %cst_11 [1] : vector<8x8xf32> to vector<8xf32>
    %12 = vector.shape_cast %11 : vector<8xf32> to vector<8x1xf32>
    %13 = arith.maximumf %10, %12 : vector<8x1xf32>
    %14 = arith.subf %10, %13 : vector<8x1xf32>
    %15 = math.exp %14 : vector<8x1xf32>
    %16 = vector.broadcast %13 : vector<8x1xf32> to vector<8x8xf32>
    %17 = arith.subf %9, %16 : vector<8x8xf32>
    %18 = math.exp %17 : vector<8x8xf32>
    %c0_12 = arith.constant 0 : index
    %c0_13 = arith.constant 0 : index
    %19 = vector.load %arg9[%c0_12, %c0_13] : memref<8x1xf32, #tpu.memory_space<vmem>>, vector<8x1xf32>
    %20 = arith.mulf %15, %19 : vector<8x1xf32>
    %cst_14 = arith.constant dense<0.000000e+00> : vector<8xf32>
    %21 = vector.multi_reduction <add>, %18, %cst_14 [1] : vector<8x8xf32> to vector<8xf32>
    %22 = vector.shape_cast %21 : vector<8xf32> to vector<8x1xf32>
    %23 = arith.addf %20, %22 : vector<8x1xf32>
    %c0_15 = arith.constant 0 : index
    %c0_16 = arith.constant 0 : index
    %24 = vector.load %arg9[%c0_15, %c0_16] : memref<8x1xf32, #tpu.memory_space<vmem>>, vector<8x1xf32>
    tpu.vector_store %arg9[%c0_15, %c0_16], %23 {strides = array<i32>} : memref<8x1xf32, #tpu.memory_space<vmem>>, vector<8x1xf32>,
    %c0_17 = arith.constant 0 : index
    %c0_18 = arith.constant 0 : index
    %25 = vector.load %arg10[%c0_17, %c0_18] : memref<8x8xf32, #tpu.memory_space<vmem>>, vector<8x8xf32>
    %26 = vector.broadcast %15 : vector<8x1xf32> to vector<8x8xf32>
    %27 = arith.mulf %26, %25 : vector<8x8xf32>
    %c0_19 = arith.constant 0 : index
    %c0_20 = arith.constant 0 : index
    %c0_21 = arith.constant 0 : index
    %c0_22 = arith.constant 0 : index
    %28 = vector.load %arg6[%c0_19, %c0_20, %c0_21, %c0_22] : memref<1x1x8x8xf32, #tpu.memory_space<vmem>>, vector<1x1x8x8xf32>
    %29 = vector.shape_cast %28 : vector<1x1x8x8xf32> to vector<8x8xf32>
    %cst_23 = arith.constant dense<0.000000e+00> : vector<8x8xf32>
    %30 = tpu.matmul %18, %29, %cst_23 {dimension_numbers = #tpu.dot_dimension_numbers<[1], [0], [0], [1], [0, 0, 1, 1], [], []>} : vector<8x8xf32>, vector<8x8xf32>, vector<8x8xf32> -> vector<8x8xf32>
    %31 = arith.addf %27, %30 : vector<8x8xf32>
    %c0_24 = arith.constant 0 : index
    %c0_25 = arith.constant 0 : index
    %32 = vector.load %arg10[%c0_24, %c0_25] : memref<8x8xf32, #tpu.memory_space<vmem>>, vector<8x8xf32>
    tpu.vector_store %arg10[%c0_24, %c0_25], %31 {strides = array<i32>} : memref<8x8xf32, #tpu.memory_space<vmem>>, vector<8x8xf32>,
    %c0_26 = arith.constant 0 : index
    %c0_27 = arith.constant 0 : index
    %33 = vector.load %arg8[%c0_26, %c0_27] : memref<8x1xf32, #tpu.memory_space<vmem>>, vector<8x1xf32>
    tpu.vector_store %arg8[%c0_26, %c0_27], %13 {strides = array<i32>} : memref<8x1xf32, #tpu.memory_space<vmem>>, vector<8x1xf32>,
    %c0_i32_28 = arith.constant 0 : i32
    %34 = arith.cmpi eq, %arg3, %c0_i32_28 : i32
    %35 = arith.extui %34 : i1 to i32
    %c0_i32_29 = arith.constant 0 : i32
    %36 = arith.cmpi ne, %35, %c0_i32_29 : i32
    scf.if %36 {
      %c0_30 = arith.constant 0 : index
      %c0_31 = arith.constant 0 : index
      %37 = vector.load %arg10[%c0_30, %c0_31] : memref<8x8xf32, #tpu.memory_space<vmem>>, vector<8x8xf32>
      %c0_32 = arith.constant 0 : index
      %c0_33 = arith.constant 0 : index
      %38 = vector.load %arg9[%c0_32, %c0_33] : memref<8x1xf32, #tpu.memory_space<vmem>>, vector<8x1xf32>
      %39 = vector.broadcast %38 : vector<8x1xf32> to vector<8x8xf32>
      %40 = arith.divf %37, %39 : vector<8x8xf32>
      %c0_34 = arith.constant 0 : index
      %c0_35 = arith.constant 0 : index
      %c0_36 = arith.constant 0 : index
      %c0_37 = arith.constant 0 : index
      %41 = vector.load %arg7[%c0_34, %c0_35, %c0_36, %c0_37] : memref<1x1x8x8xf32, #tpu.memory_space<vmem>>, vector<1x1x8x8xf32>
      %42 = vector.shape_cast %41 : vector<1x1x8x8xf32> to vector<8x8xf32>
      %43 = vector.shape_cast %40 : vector<8x8xf32> to vector<1x1x8x8xf32>
      tpu.vector_store %arg7[%c0_34, %c0_35, %c0_36, %c0_37], %43 {strides = array<i32>} : memref<1x1x8x8xf32, #tpu.memory_space<vmem>>, vector<1x1x8x8xf32>,
    } else {
    }
    return
  }
  func.func @transform_0(%arg0: i32, %arg1: i32, %arg2: i32, %arg3: i32) -> (i32, i32, i32, i32) {
    %c0_i32 = arith.constant 0 : i32
    %c0_i32_0 = arith.constant 0 : i32
    return %arg0, %arg1, %arg2, %c0_i32 : i32, i32, i32, i32
  }
  func.func @transform_1(%arg0: i32, %arg1: i32, %arg2: i32, %arg3: i32) -> (i32, i32, i32, i32) {
    %c0_i32 = arith.constant 0 : i32
    %c0_i32_0 = arith.constant 0 : i32
    return %arg0, %arg1, %arg3, %c0_i32 : i32, i32, i32, i32
  }
  func.func @transform_2(%arg0: i32, %arg1: i32, %arg2: i32, %arg3: i32) -> (i32, i32, i32, i32) {
    %c0_i32 = arith.constant 0 : i32
    %c0_i32_0 = arith.constant 0 : i32
    return %arg0, %arg1, %arg3, %c0_i32 : i32, i32, i32, i32
  }
  func.func @transform_3(%arg0: i32, %arg1: i32, %arg2: i32, %arg3: i32) -> (i32, i32, i32, i32) {
    %c0_i32 = arith.constant 0 : i32
    %c0_i32_0 = arith.constant 0 : i32
    return %arg0, %arg1, %arg2, %c0_i32 : i32, i32, i32, i32
  }
}

module attributes {stable_mosaic.version = 11 : i64} {
  func.func @_linear_kernel(%arg0: i32, %arg1: i32, %arg2: i32, %arg3: memref<16x32xf32, #tpu.memory_space<vmem>>, %arg4: memref<32x32xf32, #tpu.memory_space<vmem>>, %arg5: memref<1x32xf32, #tpu.memory_space<vmem>>, %arg6: memref<16x32xf32, #tpu.memory_space<vmem>>, %arg7: memref<16x32xf32, #tpu.memory_space<vmem>>) attributes {dimension_semantics = [#tpu.dimension_semantics<parallel>, #tpu.dimension_semantics<parallel>, #tpu.dimension_semantics<arbitrary>], iteration_bounds = array<i64: 1, 1, 1>, scalar_prefetch = 0 : i64, scratch_operands = 1 : i64, tpu.core_type = #tpu.core_type<tc>, window_params = [{transform_indices = @transform_0, window_bounds = array<i64: 16, 32>}, {transform_indices = @transform_1, window_bounds = array<i64: 32, 32>}, {transform_indices = @transform_2, window_bounds = array<i64: 1, 32>}, {transform_indices = @transform_3, window_bounds = array<i64: 16, 32>}]} {
    %c0_i32 = arith.constant 0 : i32
    %0 = arith.cmpi eq, %arg2, %c0_i32 : i32
    %1 = arith.extui %0 : i1 to i32
    %c0_i32_0 = arith.constant 0 : i32
    %2 = arith.cmpi ne, %1, %c0_i32_0 : i32
    scf.if %2 {
      %cst_10 = arith.constant 0.000000e+00 : f32
      %12 = vector.broadcast %cst_10 : f32 to vector<16x32xf32>
      %c0_11 = arith.constant 0 : index
      %c0_12 = arith.constant 0 : index
      %13 = vector.load %arg7[%c0_11, %c0_12] : memref<16x32xf32, #tpu.memory_space<vmem>>, vector<16x32xf32>
      tpu.vector_store %arg7[%c0_11, %c0_12], %12 {strides = array<i32>} : memref<16x32xf32, #tpu.memory_space<vmem>>, vector<16x32xf32>,
    } else {
    }
    %c0 = arith.constant 0 : index
    %c0_1 = arith.constant 0 : index
    %3 = vector.load %arg7[%c0, %c0_1] : memref<16x32xf32, #tpu.memory_space<vmem>>, vector<16x32xf32>
    %c0_2 = arith.constant 0 : index
    %c0_3 = arith.constant 0 : index
    %4 = vector.load %arg3[%c0_2, %c0_3] : memref<16x32xf32, #tpu.memory_space<vmem>>, vector<16x32xf32>
    %c0_4 = arith.constant 0 : index
    %c0_5 = arith.constant 0 : index
    %5 = vector.load %arg4[%c0_4, %c0_5] : memref<32x32xf32, #tpu.memory_space<vmem>>, vector<32x32xf32>
    %cst = arith.constant dense<0.000000e+00> : vector<16x32xf32>
    %6 = tpu.matmul %4, %5, %cst {dimension_numbers = #tpu.dot_dimension_numbers<[1], [0], [0], [1], [0, 0, 1, 1], [], []>} : vector<16x32xf32>, vector<32x32xf32>, vector<16x32xf32> -> vector<16x32xf32>
    %7 = arith.addf %3, %6 : vector<16x32xf32>
    %c0_6 = arith.constant 0 : index
    %c0_7 = arith.constant 0 : index
    %8 = vector.load %arg7[%c0_6, %c0_7] : memref<16x32xf32, #tpu.memory_space<vmem>>, vector<16x32xf32>
    tpu.vector_store %arg7[%c0_6, %c0_7], %7 {strides = array<i32>} : memref<16x32xf32, #tpu.memory_space<vmem>>, vector<16x32xf32>,
    %c0_i32_8 = arith.constant 0 : i32
    %9 = arith.cmpi eq, %arg2, %c0_i32_8 : i32
    %10 = arith.extui %9 : i1 to i32
    %c0_i32_9 = arith.constant 0 : i32
    %11 = arith.cmpi ne, %10, %c0_i32_9 : i32
    scf.if %11 {
      %c0_10 = arith.constant 0 : index
      %c0_11 = arith.constant 0 : index
      %12 = vector.load %arg7[%c0_10, %c0_11] : memref<16x32xf32, #tpu.memory_space<vmem>>, vector<16x32xf32>
      %c0_12 = arith.constant 0 : index
      %c0_13 = arith.constant 0 : index
      %13 = vector.load %arg5[%c0_12, %c0_13] : memref<1x32xf32, #tpu.memory_space<vmem>>, vector<1x32xf32>
      %14 = vector.broadcast %13 : vector<1x32xf32> to vector<16x32xf32>
      %15 = arith.addf %12, %14 : vector<16x32xf32>
      %c0_14 = arith.constant 0 : index
      %c0_15 = arith.constant 0 : index
      %16 = vector.load %arg6[%c0_14, %c0_15] : memref<16x32xf32, #tpu.memory_space<vmem>>, vector<16x32xf32>
      tpu.vector_store %arg6[%c0_14, %c0_15], %15 {strides = array<i32>} : memref<16x32xf32, #tpu.memory_space<vmem>>, vector<16x32xf32>,
    } else {
    }
    return
  }
  func.func @transform_0(%arg0: i32, %arg1: i32, %arg2: i32) -> (i32, i32) {
    %c0_i32 = arith.constant 0 : i32
    return %arg0, %arg2 : i32, i32
  }
  func.func @transform_1(%arg0: i32, %arg1: i32, %arg2: i32) -> (i32, i32) {
    %c0_i32 = arith.constant 0 : i32
    return %arg2, %arg1 : i32, i32
  }
  func.func @transform_2(%arg0: i32, %arg1: i32, %arg2: i32) -> (i32, i32) {
    %c0_i32 = arith.constant 0 : i32
    %c0_i32_0 = arith.constant 0 : i32
    return %c0_i32, %arg1 : i32, i32
  }
  func.func @transform_3(%arg0: i32, %arg1: i32, %arg2: i32) -> (i32, i32) {
    %c0_i32 = arith.constant 0 : i32
    return %arg0, %arg1 : i32, i32
  }
}

module attributes {stable_mosaic.version = 11 : i64} {
  func.func @_ffn_block_kernel(%arg0: i32, %arg1: i32, %arg2: memref<16x32xf32, #tpu.memory_space<vmem>>, %arg3: memref<32x64xf32, #tpu.memory_space<vmem>>, %arg4: memref<1x64xf32, #tpu.memory_space<vmem>>, %arg5: memref<64x32xf32, #tpu.memory_space<vmem>>, %arg6: memref<1x32xf32, #tpu.memory_space<vmem>>, %arg7: memref<1x32xf32, #tpu.memory_space<vmem>>, %arg8: memref<1x32xf32, #tpu.memory_space<vmem>>, %arg9: memref<16x32xf32, #tpu.memory_space<vmem>>, %arg10: memref<16x32xf32, #tpu.memory_space<vmem>>) attributes {dimension_semantics = [#tpu.dimension_semantics<parallel>, #tpu.dimension_semantics<arbitrary>], iteration_bounds = array<i64: 1, 1>, scalar_prefetch = 0 : i64, scratch_operands = 1 : i64, tpu.core_type = #tpu.core_type<tc>, window_params = [{transform_indices = @transform_0, window_bounds = array<i64: 16, 32>}, {transform_indices = @transform_1, window_bounds = array<i64: 32, 64>}, {transform_indices = @transform_2, window_bounds = array<i64: 1, 64>}, {transform_indices = @transform_3, window_bounds = array<i64: 64, 32>}, {pipeline_mode = #tpu.pipeline_mode<synchronous>, transform_indices = @transform_4, window_bounds = array<i64: 1, 32>}, {pipeline_mode = #tpu.pipeline_mode<synchronous>, transform_indices = @transform_5, window_bounds = array<i64: 1, 32>}, {pipeline_mode = #tpu.pipeline_mode<synchronous>, transform_indices = @transform_6, window_bounds = array<i64: 1, 32>}, {transform_indices = @transform_7, window_bounds = array<i64: 16, 32>}]} {
    %c0_i32 = arith.constant 0 : i32
    %0 = arith.cmpi eq, %arg1, %c0_i32 : i32
    %1 = arith.extui %0 : i1 to i32
    %c0_i32_0 = arith.constant 0 : i32
    %2 = arith.cmpi ne, %1, %c0_i32_0 : i32
    scf.if %2 {
      %cst_30 = arith.constant 0.000000e+00 : f32
      %57 = vector.broadcast %cst_30 : f32 to vector<16x32xf32>
      %c0_31 = arith.constant 0 : index
      %c0_32 = arith.constant 0 : index
      %58 = vector.load %arg10[%c0_31, %c0_32] : memref<16x32xf32, #tpu.memory_space<vmem>>, vector<16x32xf32>
      tpu.vector_store %arg10[%c0_31, %c0_32], %57 {strides = array<i32>} : memref<16x32xf32, #tpu.memory_space<vmem>>, vector<16x32xf32>,
    } else {
    }
    %c0 = arith.constant 0 : index
    %c0_1 = arith.constant 0 : index
    %3 = vector.load %arg2[%c0, %c0_1] : memref<16x32xf32, #tpu.memory_space<vmem>>, vector<16x32xf32>
    %c0_2 = arith.constant 0 : index
    %c0_3 = arith.constant 0 : index
    %4 = vector.load %arg3[%c0_2, %c0_3] : memref<32x64xf32, #tpu.memory_space<vmem>>, vector<32x64xf32>
    %cst = arith.constant dense<0.000000e+00> : vector<16x64xf32>
    %5 = tpu.matmul %3, %4, %cst {dimension_numbers = #tpu.dot_dimension_numbers<[1], [0], [0], [1], [0, 0, 1, 1], [], []>} : vector<16x32xf32>, vector<32x64xf32>, vector<16x64xf32> -> vector<16x64xf32>
    %c0_4 = arith.constant 0 : index
    %c0_5 = arith.constant 0 : index
    %6 = vector.load %arg4[%c0_4, %c0_5] : memref<1x64xf32, #tpu.memory_space<vmem>>, vector<1x64xf32>
    %7 = vector.broadcast %6 : vector<1x64xf32> to vector<16x64xf32>
    %8 = arith.addf %5, %7 : vector<16x64xf32>
    %cst_6 = arith.constant 0.707106769 : f32
    %9 = vector.broadcast %cst_6 : f32 to vector<16x64xf32>
    %10 = arith.mulf %8, %9 : vector<16x64xf32>
    %11 = math.absf %10 : vector<16x64xf32>
    %cst_7 = arith.constant 0.327591091 : f32
    %12 = vector.broadcast %cst_7 : f32 to vector<16x64xf32>
    %13 = arith.mulf %12, %11 : vector<16x64xf32>
    %cst_8 = arith.constant 1.000000e+00 : f32
    %14 = vector.broadcast %cst_8 : f32 to vector<16x64xf32>
    %15 = arith.addf %14, %13 : vector<16x64xf32>
    %cst_9 = arith.constant 1.000000e+00 : f32
    %16 = vector.broadcast %cst_9 : f32 to vector<16x64xf32>
    %17 = arith.divf %16, %15 : vector<16x64xf32>
    %cst_10 = arith.constant 1.06140542 : f32
    %18 = vector.broadcast %cst_10 : f32 to vector<16x64xf32>
    %19 = arith.mulf %18, %17 : vector<16x64xf32>
    %cst_11 = arith.constant -1.45315206 : f32
    %20 = vector.broadcast %cst_11 : f32 to vector<16x64xf32>
    %21 = arith.addf %19, %20 : vector<16x64xf32>
    %22 = arith.mulf %21, %17 : vector<16x64xf32>
    %cst_12 = arith.constant 1.42141378 : f32
    %23 = vector.broadcast %cst_12 : f32 to vector<16x64xf32>
    %24 = arith.addf %22, %23 : vector<16x64xf32>
    %25 = arith.mulf %24, %17 : vector<16x64xf32>
    %cst_13 = arith.constant -0.284496725 : f32
    %26 = vector.broadcast %cst_13 : f32 to vector<16x64xf32>
    %27 = arith.addf %25, %26 : vector<16x64xf32>
    %28 = arith.mulf %27, %17 : vector<16x64xf32>
    %cst_14 = arith.constant 0.254829586 : f32
    %29 = vector.broadcast %cst_14 : f32 to vector<16x64xf32>
    %30 = arith.addf %28, %29 : vector<16x64xf32>
    %31 = arith.mulf %30, %17 : vector<16x64xf32>
    %cst_15 = arith.constant 0.000000e+00 : f32
    %32 = vector.broadcast %cst_15 : f32 to vector<16x64xf32>
    %33 = arith.subf %32, %11 : vector<16x64xf32>
    %34 = arith.mulf %33, %11 : vector<16x64xf32>
    %35 = math.exp %34 : vector<16x64xf32>
    %36 = arith.mulf %31, %35 : vector<16x64xf32>
    %cst_16 = arith.constant 1.000000e+00 : f32
    %37 = vector.broadcast %cst_16 : f32 to vector<16x64xf32>
    %38 = arith.subf %37, %36 : vector<16x64xf32>
    %cst_17 = arith.constant 0.000000e+00 : f32
    %39 = vector.broadcast %cst_17 : f32 to vector<16x64xf32>
    %40 = arith.cmpf oge, %10, %39 : vector<16x64xf32>
    %cst_18 = arith.constant 0.000000e+00 : f32
    %41 = vector.broadcast %cst_18 : f32 to vector<16x64xf32>
    %42 = arith.subf %41, %38 : vector<16x64xf32>
    %43 = arith.select %40, %38, %42 : vector<16x64xi1>, vector<16x64xf32>
    %cst_19 = arith.constant 5.000000e-01 : f32
    %44 = vector.broadcast %cst_19 : f32 to vector<16x64xf32>
    %45 = arith.mulf %44, %8 : vector<16x64xf32>
    %cst_20 = arith.constant 1.000000e+00 : f32
    %46 = vector.broadcast %cst_20 : f32 to vector<16x64xf32>
    %47 = arith.addf %46, %43 : vector<16x64xf32>
    %48 = arith.mulf %45, %47 : vector<16x64xf32>
    %c0_21 = arith.constant 0 : index
    %c0_22 = arith.constant 0 : index
    %49 = vector.load %arg10[%c0_21, %c0_22] : memref<16x32xf32, #tpu.memory_space<vmem>>, vector<16x32xf32>
    %c0_23 = arith.constant 0 : index
    %c0_24 = arith.constant 0 : index
    %50 = vector.load %arg5[%c0_23, %c0_24] : memref<64x32xf32, #tpu.memory_space<vmem>>, vector<64x32xf32>
    %cst_25 = arith.constant dense<0.000000e+00> : vector<16x32xf32>
    %51 = tpu.matmul %48, %50, %cst_25 {dimension_numbers = #tpu.dot_dimension_numbers<[1], [0], [0], [1], [0, 0, 1, 1], [], []>} : vector<16x64xf32>, vector<64x32xf32>, vector<16x32xf32> -> vector<16x32xf32>
    %52 = arith.addf %49, %51 : vector<16x32xf32>
    %c0_26 = arith.constant 0 : index
    %c0_27 = arith.constant 0 : index
    %53 = vector.load %arg10[%c0_26, %c0_27] : memref<16x32xf32, #tpu.memory_space<vmem>>, vector<16x32xf32>
    tpu.vector_store %arg10[%c0_26, %c0_27], %52 {strides = array<i32>} : memref<16x32xf32, #tpu.memory_space<vmem>>, vector<16x32xf32>,
    %c0_i32_28 = arith.constant 0 : i32
    %54 = arith.cmpi eq, %arg1, %c0_i32_28 : i32
    %55 = arith.extui %54 : i1 to i32
    %c0_i32_29 = arith.constant 0 : i32
    %56 = arith.cmpi ne, %55, %c0_i32_29 : i32
    scf.if %56 {
      %c0_30 = arith.constant 0 : index
      %c0_31 = arith.constant 0 : index
      %57 = vector.load %arg10[%c0_30, %c0_31] : memref<16x32xf32, #tpu.memory_space<vmem>>, vector<16x32xf32>
      %c0_32 = arith.constant 0 : index
      %c0_33 = arith.constant 0 : index
      %58 = vector.load %arg6[%c0_32, %c0_33] : memref<1x32xf32, #tpu.memory_space<vmem>>, vector<1x32xf32>
      %59 = vector.broadcast %58 : vector<1x32xf32> to vector<16x32xf32>
      %60 = arith.addf %57, %59 : vector<16x32xf32>
      %c0_34 = arith.constant 0 : index
      %c0_35 = arith.constant 0 : index
      %61 = vector.load %arg2[%c0_34, %c0_35] : memref<16x32xf32, #tpu.memory_space<vmem>>, vector<16x32xf32>
      %62 = arith.addf %60, %61 : vector<16x32xf32>
      %c0_36 = arith.constant 0 : index
      %c0_37 = arith.constant 0 : index
      %63 = vector.load %arg7[%c0_36, %c0_37] : memref<1x32xf32, #tpu.memory_space<vmem>>, vector<1x32xf32>
      %c0_38 = arith.constant 0 : index
      %c0_39 = arith.constant 0 : index
      %64 = vector.load %arg8[%c0_38, %c0_39] : memref<1x32xf32, #tpu.memory_space<vmem>>, vector<1x32xf32>
      %cst_40 = arith.constant dense<0.000000e+00> : vector<16xf32>
      %65 = vector.multi_reduction <add>, %62, %cst_40 [1] : vector<16x32xf32> to vector<16xf32>
      %66 = vector.shape_cast %65 : vector<16xf32> to vector<16x1xf32>
      %cst_41 = arith.constant 3.200000e+01 : f32
      %67 = vector.broadcast %cst_41 : f32 to vector<16x1xf32>
      %68 = arith.divf %66, %67 : vector<16x1xf32>
      %69 = vector.broadcast %68 : vector<16x1xf32> to vector<16x32xf32>
      %70 = arith.subf %62, %69 : vector<16x32xf32>
      %71 = arith.mulf %70, %70 : vector<16x32xf32>
      %cst_42 = arith.constant dense<0.000000e+00> : vector<16xf32>
      %72 = vector.multi_reduction <add>, %71, %cst_42 [1] : vector<16x32xf32> to vector<16xf32>
      %73 = vector.shape_cast %72 : vector<16xf32> to vector<16x1xf32>
      %cst_43 = arith.constant 3.200000e+01 : f32
      %74 = vector.broadcast %cst_43 : f32 to vector<16x1xf32>
      %75 = arith.divf %73, %74 : vector<16x1xf32>
      %76 = vector.broadcast %68 : vector<16x1xf32> to vector<16x32xf32>
      %77 = arith.subf %62, %76 : vector<16x32xf32>
      %cst_44 = arith.constant 9.99999974E-6 : f32
      %78 = vector.broadcast %cst_44 : f32 to vector<16x1xf32>
      %79 = arith.addf %75, %78 : vector<16x1xf32>
      %80 = math.rsqrt %79 : vector<16x1xf32>
      %81 = vector.broadcast %80 : vector<16x1xf32> to vector<16x32xf32>
      %82 = arith.mulf %77, %81 : vector<16x32xf32>
      %83 = vector.broadcast %63 : vector<1x32xf32> to vector<16x32xf32>
      %84 = arith.mulf %82, %83 : vector<16x32xf32>
      %85 = vector.broadcast %64 : vector<1x32xf32> to vector<16x32xf32>
      %86 = arith.addf %84, %85 : vector<16x32xf32>
      %c0_45 = arith.constant 0 : index
      %c0_46 = arith.constant 0 : index
      %87 = vector.load %arg9[%c0_45, %c0_46] : memref<16x32xf32, #tpu.memory_space<vmem>>, vector<16x32xf32>
      tpu.vector_store %arg9[%c0_45, %c0_46], %86 {strides = array<i32>} : memref<16x32xf32, #tpu.memory_space<vmem>>, vector<16x32xf32>,
    } else {
    }
    return
  }
  func.func @transform_0(%arg0: i32, %arg1: i32) -> (i32, i32) {
    %c0_i32 = arith.constant 0 : i32
    %c0_i32_0 = arith.constant 0 : i32
    return %arg0, %c0_i32 : i32, i32
  }
  func.func @transform_1(%arg0: i32, %arg1: i32) -> (i32, i32) {
    %c0_i32 = arith.constant 0 : i32
    %c0_i32_0 = arith.constant 0 : i32
    return %c0_i32, %arg1 : i32, i32
  }
  func.func @transform_2(%arg0: i32, %arg1: i32) -> (i32, i32) {
    %c0_i32 = arith.constant 0 : i32
    %c0_i32_0 = arith.constant 0 : i32
    return %c0_i32, %arg1 : i32, i32
  }
  func.func @transform_3(%arg0: i32, %arg1: i32) -> (i32, i32) {
    %c0_i32 = arith.constant 0 : i32
    %c0_i32_0 = arith.constant 0 : i32
    return %arg1, %c0_i32 : i32, i32
  }
  func.func @transform_4(%arg0: i32, %arg1: i32) -> (i32, i32) {
    %c0_i32 = arith.constant 0 : i32
    %c0_i32_0 = arith.constant 0 : i32
    %c0_i32_1 = arith.constant 0 : i32
    return %c0_i32, %c0_i32_0 : i32, i32
  }
  func.func @transform_5(%arg0: i32, %arg1: i32) -> (i32, i32) {
    %c0_i32 = arith.constant 0 : i32
    %c0_i32_0 = arith.constant 0 : i32
    %c0_i32_1 = arith.constant 0 : i32
    return %c0_i32, %c0_i32_0 : i32, i32
  }
  func.func @transform_6(%arg0: i32, %arg1: i32) -> (i32, i32) {
    %c0_i32 = arith.constant 0 : i32
    %c0_i32_0 = arith.constant 0 : i32
    %c0_i32_1 = arith.constant 0 : i32
    return %c0_i32, %c0_i32_0 : i32, i32
  }
  func.func @transform_7(%arg0: i32, %arg1: i32) -> (i32, i32) {
    %c0_i32 = arith.constant 0 : i32
    %c0_i32_0 = arith.constant 0 : i32
    return %arg0, %c0_i32 : i32, i32
  }
}

</mosaic_0001>

<bundles_post_ra>
// kernel: transformer_encoder_forward.11
= control target key start
LH: loop header
LB: loop body
LE: loop exit
PB: predicated region body
PF: predicated region fallthrough
CT: control target
= control target key end

     0   :  { %vm29_vm0 = vcmask 261120   ;;  %vm18_vm1 = vcmask 785408   ;;  %v165_v3 = vmov 0.0   ;;  %s221_s1 = inlined_call_operand.vmem [shape: f32[32,96], index: 1, kind: input, shape index: {}]   ;;  %s222_s0 = inlined_call_operand.vmem [shape: f32[16,32], index: 0, kind: input, shape index: {}]   ;;  %s223_s2 = inlined_call_operand.vmem [shape: f32[1,96], index: 2, kind: input, shape index: {}]   ;;  %s224_s3 = inlined_call_operand.vmem [shape: f32[16,96], index: 3, kind: output, shape index: {}]  }
   0x1   :  { %v25_v0 = vld [vmem:[%s221_s1] sm:$0xff]  ;;  %v26_v1 = vld [vmem:[%s221_s1 + $0x8] sm:$0xff]  ;;  %v27_v2 = vld [vmem:[%s221_s1 + $0x10] sm:$0xff]  ;;  %20 = vst.msk [vmem:[#allocation2 + $0x8] sm:$0xff] %vm18_vm1, %v165_v3 }
   0x2   :  { %19 = vst.msk [vmem:[#allocation2] sm:$0xff] %vm18_vm1, %v165_v3  ;;  %v156_v4 = vpack.c.bf16 %v26_v1, %v25_v0  ;;  %v28_v5 = vld [vmem:[%s221_s1 + $0x18] sm:$0xff]  ;;  %v23_v6 = vld [vmem:[%s222_s0] sm:$0xff]  ;;  %v24_v8 = vld [vmem:[%s222_s0 + $0x8] sm:$0xff] }
   0x3   :  { %v160_v7 = vpack.c.bf16 %v28_v5, %v27_v2  ;;  %153 = vmatprep.mubr.msk.f32.mxu0 %vm29_vm0, %v23_v6  ;;  %v138_v15 = vld [vmem:[%s223_s2] ss:$0 sm:$0xff] }
   0x4   :  { %157 = vmatprep.subr.bf16.mxu0 %v156_v4 }
   0x5   :  { %159 = vmatpush3.bf16.msra.mxu0 %v156_v4 }
   0x6   :  { %161 = vmatprep.subr.bf16.mxu0 %v160_v7 }
   0x8   :  { %v22_v9 = vld [vmem:[#allocation2 + $0x8] sm:$0xff] }
   0x9   :  { %163 = vmatpush3.bf16.msra.mxu0 %v160_v7  ;;  %v21_v10 = vld [vmem:[#allocation2] sm:$0xff] }
   0xc   :  { %154 = vmatmul.mubr.msk.f32.vlgmr.msra.gmra.mrb[0].mxu0 %vm29_vm0, %v24_v8 }
  0xdf   :  { %v155_v11 = vpop.f32.mrb[0].mxu0 }
  0xe0   :  { %v112_v12 = vadd.f32 %v155_v11, %v22_v9  ;;  %v102_v13 = vpop.f32.mrb[1].mxu0 }
  0xe1   :  { %v111_v14 = vadd.f32 %v102_v13, %v21_v10 }
  0xe2   :  { %115 = vst.msk [vmem:[#allocation2 + $0x8] sm:$0xff] %vm18_vm1, %v112_v12 }
  0xe3   :  { %114 = vst.msk [vmem:[#allocation2] sm:$0xff] %vm18_vm1, %v111_v14 }
  0xe9   :  { %v120_v16 = vld [vmem:[#allocation2 + $0x8] sm:$0xff] }
  0xea   :  { %v129_v17 = vadd.f32 %v138_v15, %v120_v16  ;;  %v119_v18 = vld [vmem:[#allocation2] sm:$0xff] }
  0xeb   :  { %v128_v19 = vadd.f32 %v138_v15, %v119_v18 }
  0xec   :  { %131 = vst.msk [vmem:[%s224_s3 + $0x8] sm:$0xff] %vm18_vm1, %v129_v17 }
  0xed   :  { %130 = vst.msk [vmem:[%s224_s3] sm:$0xff] %vm18_vm1, %v128_v19 }

// kernel: transformer_encoder_forward.10
= control target key start
LH: loop header
LB: loop body
LE: loop exit
PB: predicated region body
PF: predicated region fallthrough
CT: control target
= control target key end

     0   :  { %vm27_vm0 = vcmask 130048   ;;  %vm18_vm1 = vcmask 261120   ;;  %v153_v3 = vmov 0.0   ;;  %s201_s1 = inlined_call_operand.vmem [shape: f32[16,32], index: 1, kind: input, shape index: {}]   ;;  %s202_s0 = inlined_call_operand.vmem [shape: f32[16,16], index: 0, kind: input, shape index: {}]   ;;  %s203_s2 = inlined_call_operand.vmem [shape: f32[1,32], index: 2, kind: input, shape index: {}]   ;;  %s204_s3 = inlined_call_operand.vmem [shape: f32[16,32], index: 3, kind: output, shape index: {}]  }
   0x1   :  { %v25_v0 = vld [vmem:[%s201_s1] sm:$0xff]  ;;  %v26_v1 = vld [vmem:[%s201_s1 + $0x8] sm:$0xff]  ;;  %20 = vst.msk [vmem:[#allocation2 + $0x8] sm:$0xff] %vm18_vm1, %v153_v3  ;;  %19 = vst.msk [vmem:[#allocation2] sm:$0xff] %vm18_vm1, %v153_v3 }
   0x2   :  { %v23_v2 = vld [vmem:[%s202_s0] sm:$0xff]  ;;  %v148_v4 = vpack.c.bf16 %v26_v1, %v25_v0  ;;  %v24_v5 = vld [vmem:[%s202_s0 + $0x8] sm:$0xff] }
   0x3   :  { %145 = vmatprep.mubr.msk.f32.mxu0 %vm27_vm0, %v23_v2  ;;  %v136_v12 = vld [vmem:[%s203_s2] ss:$0 sm:$0xff] }
   0x4   :  { %149 = vmatprep.subr.bf16.mxu0 %v148_v4 }
   0x5   :  { %151 = vmatpush3.bf16.msra.mxu0 %v148_v4 }
   0x8   :  { %146 = vmatmul.mubr.msk.f32.vlgmr.msra.gmra.mrb[0].mxu0 %vm27_vm0, %v24_v5  ;;  %v22_v6 = vld [vmem:[#allocation2 + $0x8] sm:$0xff]  ;;  %v21_v7 = vld [vmem:[#allocation2] sm:$0xff] }
  0xdb   :  { %v147_v8 = vpop.f32.mrb[0].mxu0 }
  0xdc   :  { %v110_v9 = vadd.f32 %v147_v8, %v22_v6  ;;  %v100_v10 = vpop.f32.mrb[1].mxu0 }
  0xdd   :  { %v109_v11 = vadd.f32 %v100_v10, %v21_v7 }
  0xde   :  { %113 = vst.msk [vmem:[#allocation2 + $0x8] sm:$0xff] %vm18_vm1, %v110_v9 }
  0xdf   :  { %112 = vst.msk [vmem:[#allocation2] sm:$0xff] %vm18_vm1, %v109_v11 }
  0xe5   :  { %v118_v13 = vld [vmem:[#allocation2 + $0x8] sm:$0xff] }
  0xe6   :  { %v127_v14 = vadd.f32 %v136_v12, %v118_v13  ;;  %v117_v15 = vld [vmem:[#allocation2] sm:$0xff] }
  0xe7   :  { %v126_v16 = vadd.f32 %v136_v12, %v117_v15 }
  0xe8   :  { %129 = vst.msk [vmem:[%s204_s3 + $0x8] sm:$0xff] %vm18_vm1, %v127_v14 }
  0xe9   :  { %128 = vst.msk [vmem:[%s204_s3] sm:$0xff] %vm18_vm1, %v126_v16 }

// kernel: transformer_encoder_forward.19
= control target key start
LH: loop header
LB: loop body
LE: loop exit
PB: predicated region body
PF: predicated region fallthrough
CT: control target
= control target key end

     0   :  { %vm18_vm0 = vcmask 261120   ;;  %v164_v3 = vmov 0.0   ;;  %s220_s1 = inlined_call_operand.vmem [shape: f32[32,32], index: 1, kind: input, shape index: {}]   ;;  %s221_s0 = inlined_call_operand.vmem [shape: f32[16,32], index: 0, kind: input, shape index: {}]   ;;  %s222_s2 = inlined_call_operand.vmem [shape: f32[1,32], index: 2, kind: input, shape index: {}]   ;;  %s223_s3 = inlined_call_operand.vmem [shape: f32[16,32], index: 3, kind: output, shape index: {}]  }
   0x1   :  { %v25_v0 = vld [vmem:[%s220_s1] sm:$0xff]  ;;  %v26_v1 = vld [vmem:[%s220_s1 + $0x8] sm:$0xff]  ;;  %v27_v2 = vld [vmem:[%s220_s1 + $0x10] sm:$0xff]  ;;  %20 = vst.msk [vmem:[#allocation2 + $0x8] sm:$0xff] %vm18_vm0, %v164_v3 }
   0x2   :  { %19 = vst.msk [vmem:[#allocation2] sm:$0xff] %vm18_vm0, %v164_v3  ;;  %v155_v4 = vpack.c.bf16 %v26_v1, %v25_v0  ;;  %v28_v5 = vld [vmem:[%s220_s1 + $0x18] sm:$0xff]  ;;  %v23_v6 = vld [vmem:[%s221_s0] sm:$0xff]  ;;  %v24_v8 = vld [vmem:[%s221_s0 + $0x8] sm:$0xff] }
   0x3   :  { %v159_v7 = vpack.c.bf16 %v28_v5, %v27_v2  ;;  %152 = vmatprep.mubr.msk.f32.mxu0 %vm18_vm0, %v23_v6  ;;  %v137_v15 = vld [vmem:[%s222_s2] ss:$0 sm:$0xff] }
   0x4   :  { %156 = vmatprep.subr.bf16.mxu0 %v155_v4 }
   0x5   :  { %158 = vmatpush3.bf16.msra.mxu0 %v155_v4 }
   0x6   :  { %160 = vmatprep.subr.bf16.mxu0 %v159_v7 }
   0x8   :  { %v22_v9 = vld [vmem:[#allocation2 + $0x8] sm:$0xff] }
   0x9   :  { %162 = vmatpush3.bf16.msra.mxu0 %v159_v7  ;;  %v21_v10 = vld [vmem:[#allocation2] sm:$0xff] }
   0xc   :  { %153 = vmatmul.mubr.msk.f32.vlgmr.msra.gmra.mrb[0].mxu0 %vm18_vm0, %v24_v8 }
  0xdf   :  { %v154_v11 = vpop.f32.mrb[0].mxu0 }
  0xe0   :  { %v112_v12 = vadd.f32 %v154_v11, %v22_v9  ;;  %v102_v13 = vpop.f32.mrb[1].mxu0 }
  0xe1   :  { %v111_v14 = vadd.f32 %v102_v13, %v21_v10 }
  0xe2   :  { %114 = vst.msk [vmem:[#allocation2 + $0x8] sm:$0xff] %vm18_vm0, %v112_v12 }
  0xe3   :  { %113 = vst.msk [vmem:[#allocation2] sm:$0xff] %vm18_vm0, %v111_v14 }
  0xe9   :  { %v119_v16 = vld [vmem:[#allocation2 + $0x8] sm:$0xff] }
  0xea   :  { %v128_v17 = vadd.f32 %v137_v15, %v119_v16  ;;  %v118_v18 = vld [vmem:[#allocation2] sm:$0xff] }
  0xeb   :  { %v127_v19 = vadd.f32 %v137_v15, %v118_v18 }
  0xec   :  { %130 = vst.msk [vmem:[%s223_s3 + $0x8] sm:$0xff] %vm18_vm0, %v128_v17 }
  0xed   :  { %129 = vst.msk [vmem:[%s223_s3] sm:$0xff] %vm18_vm0, %v127_v19 }

// kernel: transformer_encoder_forward.13
= control target key start
LH: loop header
LB: loop body
LE: loop exit
PB: predicated region body
PF: predicated region fallthrough
CT: control target
= control target key end

     0   :  { %vm27_vm0 = vcmask 261120   ;;  %v228_v3 = vmov 0.0   ;;  %s315_s1 = inlined_call_operand.vmem [shape: f32[32,32], index: 1, kind: input, shape index: {}]   ;;  %s316_s0 = inlined_call_operand.vmem [shape: f32[16,32], index: 0, kind: input, shape index: {}]   ;;  %s317_s2 = inlined_call_operand.vmem [shape: f32[1,32], index: 2, kind: input, shape index: {}]   ;;  %s318_s3 = inlined_call_operand.vmem [shape: f32[16,32], index: 3, kind: input, shape index: {}]   ;;  %s319_s4 = inlined_call_operand.vmem [shape: f32[1,32], index: 4, kind: input, shape index: {}]   ;;  %s320_s5 = inlined_call_operand.vmem [shape: f32[1,32], index: 5, kind: input, shape index: {}]   ;;  %s321_s6 = inlined_call_operand.vmem [shape: f32[16,32], index: 6, kind: output, shape index: {}]  }
   0x1   :  { %v34_v0 = vld [vmem:[%s315_s1] sm:$0xff]  ;;  %v35_v1 = vld [vmem:[%s315_s1 + $0x8] sm:$0xff]  ;;  %v36_v2 = vld [vmem:[%s315_s1 + $0x10] sm:$0xff]  ;;  %29 = vst.msk [vmem:[#allocation2 + $0x8] sm:$0xff] %vm27_vm0, %v228_v3 }
   0x2   :  { %28 = vst.msk [vmem:[#allocation2] sm:$0xff] %vm27_vm0, %v228_v3  ;;  %v215_v4 = vpack.c.bf16 %v35_v1, %v34_v0  ;;  %v37_v5 = vld [vmem:[%s315_s1 + $0x18] sm:$0xff]  ;;  %v32_v6 = vld [vmem:[%s316_s0] sm:$0xff]  ;;  %v33_v8 = vld [vmem:[%s316_s0 + $0x8] sm:$0xff] }
   0x3   :  { %v219_v7 = vpack.c.bf16 %v37_v5, %v36_v2  ;;  %212 = vmatprep.mubr.msk.f32.mxu0 %vm27_vm0, %v32_v6  ;;  %v195_v15 = vld [vmem:[%s317_s2] ss:$0 sm:$0xff]  ;;  %v139_v21 = vld [vmem:[%s318_s3 + $0x8] sm:$0xff] }
   0x4   :  { %216 = vmatprep.subr.bf16.mxu0 %v215_v4  ;;  %v138_v18 = vld [vmem:[%s318_s3] sm:$0xff] }
   0x5   :  { %218 = vmatpush3.bf16.msra.mxu0 %v215_v4  ;;  %v196_v43 = vld [vmem:[%s319_s4] ss:$0 sm:$0xff] }
   0x6   :  { %220 = vmatprep.subr.bf16.mxu0 %v219_v7  ;;  %v197_v45 = vld [vmem:[%s320_s5] ss:$0 sm:$0xff] }
   0x8   :  { %v31_v9 = vld [vmem:[#allocation2 + $0x8] sm:$0xff] }
   0x9   :  { %222 = vmatpush3.bf16.msra.mxu0 %v219_v7  ;;  %v30_v10 = vld [vmem:[#allocation2] sm:$0xff] }
   0xc   :  { %213 = vmatmul.mubr.msk.f32.vlgmr.msra.gmra.mrb[0].mxu0 %vm27_vm0, %v33_v8 }
  0xdf   :  { %v214_v11 = vpop.f32.mrb[0].mxu0 }
  0xe0   :  { %v121_v12 = vadd.f32 %v214_v11, %v31_v9  ;;  %v111_v13 = vpop.f32.mrb[1].mxu0 }
  0xe1   :  { %v120_v14 = vadd.f32 %v111_v13, %v30_v10 }
  0xe2   :  { %123 = vst.msk [vmem:[#allocation2 + $0x8] sm:$0xff] %vm27_vm0, %v121_v12 }
  0xe3   :  { %122 = vst.msk [vmem:[#allocation2] sm:$0xff] %vm27_vm0, %v120_v14 }
  0xe9   :  { %v128_v16 = vld [vmem:[#allocation2 + $0x8] sm:$0xff] }
  0xea   :  { %v127_v17 = vld [vmem:[#allocation2] sm:$0xff]  ;;  %v137_v20 = vadd.f32 %v195_v15, %v128_v16 }
  0xeb   :  { %v136_v19 = vadd.f32 %v195_v15, %v127_v17 }
  0xec   :  { %v141_v24 = vadd.f32 %v139_v21, %v137_v20 }
  0xed   :  { %v140_v22 = vadd.f32 %v138_v18, %v136_v19 }
  0xee   :  { %v147_v25 = vsel %vm27_vm0, %v141_v24, 0.0 }
  0xef   :  { %v144_v23 = vsel %vm27_vm0, %v140_v22, 0.0 }
  0xf0   :  { %145 = vadd.xlane.f32.xlu0 %v144_v23 }
  0xf4   :  { %148 = vadd.xlane.f32.xlu0 %v147_v25 }
 0x17d   :  { %v146_v26 = vpop.xlane.xlu0 %145 }
 0x17e   :  { %v151_v27 = vmul.f32 0.03125, %v146_v26 }
 0x180   :  { %v153_v28 = vsub.f32 %v140_v22, %v151_v27 }
 0x181   :  { %v149_v29 = vpop.xlane.xlu0 %148 }
 0x182   :  { %v152_v30 = vmul.f32 0.03125, %v149_v29  ;;  %v155_v31 = vmul.f32 %v153_v28, %v153_v28 }
 0x184   :  { %v154_v32 = vsub.f32 %v141_v24, %v152_v30  ;;  %v157_v33 = vsel %vm27_vm0, %v155_v31, 0.0 }
 0x185   :  { %158 = vadd.xlane.f32.xlu1 %v157_v33 }
 0x186   :  { %v156_v34 = vmul.f32 %v154_v32, %v154_v32 }
 0x188   :  { %v160_v35 = vsel %vm27_vm0, %v156_v34, 0.0 }
 0x189   :  { %161 = vadd.xlane.f32.xlu1 %v160_v35 }
 0x212   :  { %v159_v36 = vpop.xlane.xlu1 %158 }
 0x213   :  { %v163_v37 = vmul.f32 0.03125, %v159_v36 }
 0x215   :  { %v165_v38 = vadd.f32 1e-05, %v163_v37 }
 0x216   :  { %v162_v39 = vpop.xlane.xlu1 %161 }
 0x217   :  { %224 = vrsqrt.f32 %v165_v38  ;;  %v164_v40 = vmul.f32 0.03125, %v162_v39 }
 0x219   :  { %v166_v41 = vadd.f32 1e-05, %v164_v40 }
 0x21b   :  { %226 = vrsqrt.f32 %v166_v41 }
 0x221   :  { %v225_v42 = vpop.eup %224 }
 0x222   :  { %v169_v44 = vmul.f32 %v225_v42, %v153_v28 }
 0x224   :  { %v177_v46 = vmul.f32 %v196_v43, %v169_v44 }
 0x225   :  { %v227_v47 = vpop.eup %226 }
 0x226   :  { %v185_v48 = vadd.f32 %v197_v45, %v177_v46  ;;  %v170_v49 = vmul.f32 %v227_v47, %v154_v32 }
 0x228   :  { %187 = vst.msk [vmem:[%s321_s6] sm:$0xff] %vm27_vm0, %v185_v48  ;;  %v178_v50 = vmul.f32 %v196_v43, %v170_v49 }
 0x22a   :  { %v186_v51 = vadd.f32 %v197_v45, %v178_v50 }
 0x22c   :  { %188 = vst.msk [vmem:[%s321_s6 + $0x8] sm:$0xff] %vm27_vm0, %v186_v51 }

// kernel: transformer_encoder_forward.14
= control target key start
LH: loop header
LB: loop body
LE: loop exit
PB: predicated region body
PF: predicated region fallthrough
CT: control target
= control target key end

     0   :  { %vm30_vm0 = vcmask 261120   ;;  %v438_v20 = vmov 0.0   ;;  %vm192_vm3 = vcmask 523264   ;;  %s559_s1 = inlined_call_operand.vmem [shape: f32[32,64], index: 1, kind: input, shape index: {}]   ;;  %s560_s0 = inlined_call_operand.vmem [shape: f32[16,32], index: 0, kind: input, shape index: {}]   ;;  %s561_s3 = inlined_call_operand.vmem [shape: f32[64,32], index: 3, kind: input, shape index: {}]   ;;  %s562_s2 = inlined_call_operand.vmem [shape: f32[1,64], index: 2, kind: input, shape index: {}]   ;;  %s563_s4 = inlined_call_operand.vmem [shape: f32[1,32], index: 4, kind: input, shape index: {}]   ;;  %s564_s5 = inlined_call_operand.vmem [shape: f32[1,32], index: 5, kind: input, shape index: {}]   ;;  %s565_s6 = inlined_call_operand.vmem [shape: f32[1,32], index: 6, kind: input, shape index: {}]   ;;  %s566_s7 = inlined_call_operand.vmem [shape: f32[16,32], index: 7, kind: output, shape index: {}]  }
   0x1   :  { %v35_v0 = vld [vmem:[%s559_s1] sm:$0xff]  ;;  %v36_v1 = vld [vmem:[%s559_s1 + $0x8] sm:$0xff]  ;;  %v37_v2 = vld [vmem:[%s559_s1 + $0x10] sm:$0xff]  ;;  %32 = vst.msk [vmem:[#allocation2 + $0x8] sm:$0xff] %vm30_vm0, %v438_v20 }
   0x2   :  { %v401_v3 = vpack.c.bf16 %v36_v1, %v35_v0  ;;  %v38_v4 = vld [vmem:[%s559_s1 + $0x18] sm:$0xff]  ;;  %v494_v5 = vld [vmem:[%s560_s0] sm:$0xff]  ;;  %v501_v7 = vld [vmem:[%s560_s0 + $0x8] sm:$0xff]  ;;  %31 = vst.msk [vmem:[#allocation2] sm:$0xff] %vm30_vm0, %v438_v20 }
   0x3   :  { %v405_v6 = vpack.c.bf16 %v38_v4, %v37_v2  ;;  %379 = vmatprep.mubr.msk.f32.mxu0 %vm30_vm0, %v494_v5  ;;  %v184_v8 = vld [vmem:[%s561_s3] sm:$0xff]  ;;  %v185_v9 = vld [vmem:[%s561_s3 + $0x8] sm:$0xff]  ;;  %v186_v11 = vld [vmem:[%s561_s3 + $0x10] sm:$0xff] }
   0x4   :  { %402 = vmatprep.subr.bf16.mxu0 %v401_v3  ;;  %v409_v10 = vpack.c.bf16 %v185_v9, %v184_v8  ;;  %v187_v12 = vld [vmem:[%s561_s3 + $0x18] sm:$0xff]  ;;  %v188_v14 = vld [vmem:[%s561_s3 + $0x20] sm:$0xff]  ;;  %v189_v15 = vld [vmem:[%s561_s3 + $0x28] sm:$0xff] }
   0x5   :  { %404 = vmatpush3.bf16.msra.mxu0 %v401_v3  ;;  %v413_v13 = vpack.c.bf16 %v187_v12, %v186_v11  ;;  %v417_v16 = vpack.c.bf16 %v189_v15, %v188_v14  ;;  %v190_v17 = vld [vmem:[%s561_s3 + $0x30] sm:$0xff]  ;;  %v191_v18 = vld [vmem:[%s561_s3 + $0x38] sm:$0xff]  ;;  %v347_v21 = vld [vmem:[%s562_s2] ss:$0 sm:$0xff] }
   0x6   :  { %406 = vmatprep.subr.bf16.mxu0 %v405_v6  ;;  %410 = vmatprep.subr.bf16.mxu1 %v409_v10  ;;  %v421_v19 = vpack.c.bf16 %v191_v18, %v190_v17  ;;  %v352_v20 = vld [vmem:[%s563_s4] ss:$0 sm:$0xff] }
   0x7   :  { %412 = vmatpush3.bf16.msra.mxu1 %v409_v10 }
   0x8   :  { %414 = vmatprep.subr.bf16.mxu1 %v413_v13  ;;  %v183_v14 = vld [vmem:[#allocation2 + $0x8] sm:$0xff] }
   0x9   :  { %408 = vmatpush3.bf16.msra.mxu0 %v405_v6  ;;  %v182_v15 = vld [vmem:[#allocation2] sm:$0xff] }
   0xb   :  { %416 = vmatpush3.bf16.msra.mxu1 %v413_v13 }
   0xc   :  { %380 = vmatmul.mubr.msk.f32.vlgmr.msra.gmra.mrb[0].mxu0 %vm30_vm0, %v501_v7  ;;  %418 = vmatprep.subr.bf16.mxu1 %v417_v16 }
   0xf   :  { %420 = vmatpush3.bf16.msra.mxu1 %v417_v16 }
  0x10   :  { %422 = vmatprep.subr.bf16.mxu1 %v421_v19 }
  0x13   :  { %424 = vmatpush3.bf16.msra.mxu1 %v421_v19 }
  0xdf   :  { %v381_v22 = vpop.f32.mrb[0].mxu0 }
  0xe0   :  { %v125_v23 = vadd.f32 %v381_v22, %v347_v21  ;;  %v119_v24 = vpop.f32.mrb[1].mxu0 }
  0xe1   :  { %v120_v25 = vadd.f32 %v347_v21, %v119_v24 }
  0xe2   :  { %v129_v26 = vmul.f32 0.70710677, %v125_v23  ;;  %v177_v11 = vmul.f32 0.5, %v125_v23 }
  0xe3   :  { %v128_v27 = vmul.f32 0.70710677, %v120_v25  ;;  %v176_v9 = vmul.f32 0.5, %v120_v25 }
  0xe4   :  { %v131_v28 = vand.u32 2147483647, %v129_v26  ;;  %vm171_vm1 = vcmp.ge.f32.partialorder %v129_v26, 0.0 }
  0xe5   :  { %v130_v29 = vand.u32 2147483647, %v128_v27  ;;  %vm170_vm2 = vcmp.ge.f32.partialorder %v128_v27, 0.0 }
  0xe6   :  { %v133_v30 = vmul.f32 0.3275911, %v131_v28  ;;  %v159_v34 = vsub.f32 0.0, %v131_v28 }
  0xe7   :  { %v132_v31 = vmul.f32 0.3275911, %v130_v29  ;;  %v158_v35 = vsub.f32 0.0, %v130_v29 }
  0xe8   :  { %v135_v32 = vadd.f32 1.0, %v133_v30  ;;  %v161_v37 = vmul.f32 %v159_v34, %v131_v28 }
  0xe9   :  { %v134_v33 = vadd.f32 1.0, %v132_v31  ;;  %v160_v40 = vmul.f32 %v158_v35, %v130_v29 }
  0xea   :  { %426 = vrcp.f32 %v135_v32  ;;  %v164_v43 = vmul.f32 1.442695, %v161_v37 }
  0xeb   :  { %428 = vrcp.f32 %v134_v33  ;;  %v162_v46 = vmul.f32 1.442695, %v160_v40 }
  0xec   :  { %430 = vpow2.f32 %v164_v43 }
  0xed   :  { %432 = vpow2.f32 %v162_v46  ;;  %v354_v46 = vld [vmem:[%s565_s6] ss:$0 sm:$0xff] }
  0xf4   :  { %v427_v36 = vpop.eup %426 }
  0xf5   :  { %v429_v38 = vpop.eup %428  ;;  %v141_v39 = vmul.f32 1.0614054, %v427_v36 }
  0xf6   :  { %v140_v41 = vmul.f32 1.0614054, %v429_v38  ;;  %v431_v59 = vpop.eup %430 }
  0xf7   :  { %v143_v42 = vadd.f32 -1.4531521, %v141_v39  ;;  %v433_v61 = vpop.eup %432 }
  0xf8   :  { %v142_v44 = vadd.f32 -1.4531521, %v140_v41 }
  0xf9   :  { %v145_v45 = vmul.f32 %v427_v36, %v143_v42 }
  0xfa   :  { %v144_v47 = vmul.f32 %v429_v38, %v142_v44  ;;  %v353_v44 = vld [vmem:[%s564_s5] ss:$0 sm:$0xff] }
  0xfb   :  { %v147_v48 = vadd.f32 1.4214138, %v145_v45 }
  0xfc   :  { %v146_v49 = vadd.f32 1.4214138, %v144_v47 }
  0xfd   :  { %v149_v50 = vmul.f32 %v427_v36, %v147_v48 }
  0xfe   :  { %v148_v51 = vmul.f32 %v429_v38, %v146_v49 }
  0xff   :  { %v151_v52 = vadd.f32 -0.28449672, %v149_v50 }
 0x100   :  { %v150_v53 = vadd.f32 -0.28449672, %v148_v51 }
 0x101   :  { %v153_v54 = vmul.f32 %v427_v36, %v151_v52 }
 0x102   :  { %v152_v55 = vmul.f32 %v429_v38, %v150_v53 }
 0x103   :  { %v155_v56 = vadd.f32 0.2548296, %v153_v54 }
 0x104   :  { %v154_v57 = vadd.f32 0.2548296, %v152_v55 }
 0x105   :  { %v157_v58 = vmul.f32 %v427_v36, %v155_v56 }
 0x106   :  { %v156_v60 = vmul.f32 %v429_v38, %v154_v57 }
 0x107   :  { %v167_v62 = vmul.f32 %v431_v59, %v157_v58 }
 0x108   :  { %v166_v63 = vmul.f32 %v433_v61, %v156_v60 }
 0x109   :  { %v169_v0 = vsub.f32 1.0, %v167_v62 }
 0x10a   :  { %v168_v1 = vsub.f32 1.0, %v166_v63 }
 0x10b   :  { %v173_v2 = vsub.f32 0.0, %v169_v0 }
 0x10c   :  { %v172_v3 = vsub.f32 0.0, %v168_v1 }
 0x10d   :  { %v175_v4 = vsel %vm171_vm1, %v169_v0, %v173_v2 }
 0x10e   :  { %v179_v6 = vadd.f32 1.0, %v175_v4  ;;  %v174_v8 = vsel %vm170_vm2, %v168_v1, %v172_v3 }
 0x10f   :  { %v178_v10 = vadd.f32 1.0, %v174_v8 }
 0x110   :  { %v181_v13 = vmul.f32 %v179_v6, %v177_v11 }
 0x111   :  { %v180_v12 = vmul.f32 %v178_v10, %v176_v9 }
 0x113   :  { %398 = vmatprep.mubr.msk.f32.mxu1 %vm192_vm3, %v180_v12 }
 0x114   :  { %399 = vmatmul.mubr.msk.f32.vlgmr.msra.gmra.mrb[0].mxu1 %vm192_vm3, %v181_v13 }
 0x1e7   :  { %v400_v16 = vpop.f32.mrb[0].mxu1 }
 0x1e8   :  { %v275_v17 = vadd.f32 %v400_v16, %v183_v14  ;;  %v265_v18 = vpop.f32.mrb[1].mxu1 }
 0x1e9   :  { %v274_v19 = vadd.f32 %v265_v18, %v182_v15 }
 0x1ea   :  { %277 = vst.msk [vmem:[#allocation2 + $0x8] sm:$0xff] %vm30_vm0, %v275_v17 }
 0x1eb   :  { %276 = vst.msk [vmem:[#allocation2] sm:$0xff] %vm30_vm0, %v274_v19 }
 0x1f1   :  { %v282_v21 = vld [vmem:[#allocation2 + $0x8] sm:$0xff] }
 0x1f2   :  { %v281_v22 = vld [vmem:[#allocation2] sm:$0xff]  ;;  %v291_v24 = vadd.f32 %v352_v20, %v282_v21 }
 0x1f3   :  { %v290_v23 = vadd.f32 %v352_v20, %v281_v22 }
 0x1f4   :  { %v295_v27 = vadd.f32 %v291_v24, %v501_v7 }
 0x1f5   :  { %v294_v25 = vadd.f32 %v290_v23, %v494_v5 }
 0x1f6   :  { %v301_v28 = vsel %vm30_vm0, %v295_v27, 0.0 }
 0x1f7   :  { %v298_v26 = vsel %vm30_vm0, %v294_v25, 0.0 }
 0x1f8   :  { %299 = vadd.xlane.f32.xlu0 %v298_v26 }
 0x1fc   :  { %302 = vadd.xlane.f32.xlu0 %v301_v28 }
 0x285   :  { %v300_v29 = vpop.xlane.xlu0 %299 }
 0x286   :  { %v305_v30 = vmul.f32 0.03125, %v300_v29 }
 0x288   :  { %v307_v31 = vsub.f32 %v294_v25, %v305_v30 }
 0x289   :  { %v303_v32 = vpop.xlane.xlu0 %302 }
 0x28a   :  { %v306_v33 = vmul.f32 0.03125, %v303_v32  ;;  %v309_v34 = vmul.f32 %v307_v31, %v307_v31 }
 0x28c   :  { %v308_v35 = vsub.f32 %v295_v27, %v306_v33  ;;  %v311_v36 = vsel %vm30_vm0, %v309_v34, 0.0 }
 0x28d   :  { %312 = vadd.xlane.f32.xlu1 %v311_v36 }
 0x28e   :  { %v310_v37 = vmul.f32 %v308_v35, %v308_v35 }
 0x290   :  { %v314_v5 = vsel %vm30_vm0, %v310_v37, 0.0 }
 0x291   :  { %315 = vadd.xlane.f32.xlu1 %v314_v5 }
 0x31a   :  { %v313_v38 = vpop.xlane.xlu1 %312 }
 0x31b   :  { %v317_v7 = vmul.f32 0.03125, %v313_v38 }
 0x31d   :  { %v319_v39 = vadd.f32 1e-05, %v317_v7 }
 0x31e   :  { %v316_v40 = vpop.xlane.xlu1 %315 }
 0x31f   :  { %434 = vrsqrt.f32 %v319_v39  ;;  %v318_v41 = vmul.f32 0.03125, %v316_v40 }
 0x321   :  { %v320_v42 = vadd.f32 1e-05, %v318_v41 }
 0x323   :  { %436 = vrsqrt.f32 %v320_v42 }
 0x329   :  { %v435_v43 = vpop.eup %434 }
 0x32a   :  { %v323_v45 = vmul.f32 %v435_v43, %v307_v31 }
 0x32c   :  { %v331_v47 = vmul.f32 %v353_v44, %v323_v45 }
 0x32d   :  { %v437_v48 = vpop.eup %436 }
 0x32e   :  { %v339_v49 = vadd.f32 %v354_v46, %v331_v47  ;;  %v324_v50 = vmul.f32 %v437_v48, %v308_v35 }
 0x330   :  { %341 = vst.msk [vmem:[%s566_s7] sm:$0xff] %vm30_vm0, %v339_v49  ;;  %v332_v51 = vmul.f32 %v353_v44, %v324_v50 }
 0x332   :  { %v340_v52 = vadd.f32 %v354_v46, %v332_v51 }
 0x334   :  { %342 = vst.msk [vmem:[%s566_s7 + $0x8] sm:$0xff] %vm30_vm0, %v340_v52 }

// kernel: transformer_encoder_forward.12
= control target key start
LH: loop header
LB: loop body
LE: loop exit
PB: predicated region body
PF: predicated region fallthrough
CT: control target
= control target key end

     0   :  { %s824_s12 = smov 0   ;;  %s826_s13 = smov 0   ;;  %s899_s0 = inlined_call_operand.vmem [shape: f32[2,4,8,8], index: 0, kind: input, shape index: {}]   ;;  %s900_s1 = inlined_call_operand.vmem [shape: f32[2,4,8,8], index: 1, kind: input, shape index: {}]   ;;  %s901_s2 = inlined_call_operand.vmem [shape: f32[2,4,8,8], index: 2, kind: input, shape index: {}]   ;;  %s902_s3 = inlined_call_operand.vmem [shape: f32[2,4,8,8], index: 3, kind: output, shape index: {}]  }
   0x1   :  { %s828_s14 = smov 0   ;;  %s830_s15 = smov 0  }
   0x2   :  { %s832_s16 = smov 0  }
   0x3 LB: > { %s35_s17 = sadd.s32 1, %s790_s14  ;;  %s39_s18 = sadd.s32 1, %s794_s15  ;;  %s798_s16 = sphi %s832_s16, %s13_s16   ;;  %s794_s15 = sphi %s830_s15, %s906_s15   ;;  %s790_s14 = sphi %s828_s14, %s905_s14   ;;  %s786_s13 = sphi %s826_s13, %s904_s13   ;;  %s782_s12 = sphi %s824_s12, %s903_s12  }
   0x4   : > { %p37_p0 = scmp.ge.s32.totalorder %s35_s17, 4  ;;  %p680_p1 = scmp.ge.s32.totalorder %s798_s16, 1 }
   0x5   : > { %p217_p2 = scmp.lt.s32.totalorder %s798_s16, 9 }
   0x6   : > { %s908_s17 = smov (%p37_p0, %s35_s17), 0  ;;  %s910_s18 = smov (!%p37_p0, %s39_s18), %s794_s15 }
   0x7   : > { %p218_p3 = pnand %p680_p1, %p217_p2  ;;  %p41_p4 = scmp.ge.s32.totalorder %s910_s18, 2 }
   0x8   : > { %p275_p5 = scmp.lt.s32.totalorder (!%p218_p3), %s786_s13, 1  ;;  %p277_p6 = scmp.lt.s32.totalorder (!%p218_p3), %s782_s12, 3  ;;  %vm326_vm0 = vcmask (!%p218_p3), 64512   ;;  %v800_v0 = vmov (!%p218_p3), 0.0   ;;  %vm801_vm1 = vmmov (!%p218_p3), 0   ;;  %vm323_vm2 = vcmask (!%p218_p3), 7168  }
   0x9   : > { %s912_s18 = smov (%p41_p4, %s910_s18), 0  ;;  %221 = sbr.rel (%p218_p3) target bundleno = 820 (0x334), region = 32 }
   0xa   : > { %698 = vmatprep.subr.mxu0 (!%p218_p3), %v800_v0  ;;  %327 = vst.msk [vmem:[#allocation4] sm:$0xff] (!%p218_p3), %vm326_vm0, %v800_v0  ;;  %700 = vmatprep.mubr.msk.f32.mxu0 (!%p218_p3), %vm801_vm1, %v800_v0  ;;  %v802_v4 = vmov (!%p218_p3), -inf   ;;  %v803_v8 = vmov (!%p218_p3), 0  }
   0xb   : > { %703 = vmatprep.subr.mxu1 (!%p218_p3), %v800_v0  ;;  %705 = vmatprep.mubr.msk.f32.mxu1 (!%p218_p3), %vm801_vm1, %v800_v0  ;;  %324 = vst.msk [vmem:[#allocation2] sm:$0xff] (!%p218_p3), %vm323_vm2, %v802_v4  ;;  %325 = vst.msk [vmem:[#allocation3] sm:$0xff] (!%p218_p3), %vm323_vm2, %v800_v0 }
   0xc   : > { %752 = vset.pattern.permute.xlu0 (!%p218_p3), %v803_v8  ;;  %753 = vset.pattern.permute.xlu1 (!%p218_p3), %v803_v8 }
  0x10   : > { %s914_s13 = smov (!%p275_p5, %s786_s13), 1  ;;  %s916_s12 = smov (!%p277_p6, %s782_s12), 3 }
  0x11   : > { %s681_s19 = sshll.u32 %s914_s13, 2  ;;  %v432_v26 = vld [vmem:[#allocation4] sm:$0xff] }
  0x12   : > { %s283_s20 = sadd.s32 %s681_s19, %s916_s12  ;;  %v408_v9 = vld [vmem:[#allocation2] sm:$0xff]  ;;  %v424_v21 = vld [vmem:[#allocation3] sm:$0xff] }
  0x13   : > { %s855_s21 = sshll.u32 %s283_s20, 3 }
  0x14   : > { %s296_s24 = scalar_lea.vmem %s900_s1, %s855_s21  ;;  %s285_s27 = scalar_lea.vmem %s899_s0, %s855_s21 }
  0x15   : > { %v330_v1 = vld [vmem:[%s296_s24] sm:$0xff]  ;;  %s307_s30 = scalar_lea.vmem %s901_s2, %s855_s21  ;;  %s318_s6 = scalar_lea.vmem %s902_s3, %s855_s21 }
  0x16   : > { %699 = vmatpush3.xpose.msk.msra.mxu0 %vm326_vm0, %v330_v1  ;;  %v328_v2 = vld [vmem:[%s285_s27] sm:$0xff] }
  0x17   : > { %v329_v3 = vmul.f32 0.35355338, %v328_v2  ;;  %v439_v13 = vld [vmem:[%s307_s30] sm:$0xff] }
  0x18   : > { %704 = vmatpush3.msra.mxu1 %v439_v13 }
  0x19   : > { %701 = vmatmul.mubr.msk.f32.vlgmr.msra.gmra.mrb[0].mxu0 %vm326_vm0, %v329_v3 }
  0xec   : > { %v404_v5 = vpop.f32.mrb[0].mxu0 }
  0xed   : > { %v702_v6 = vpop.f32.mrb[1].mxu0  ;;  %v409_v7 = vsel %vm326_vm0, %v404_v5, -inf }
  0xee   : > { %410 = vmax.xlane.f32.xlu0 %v409_v7 }
 0x17b   : > { %v411_v10 = vpop.xlane.xlu0 %410 }
 0x17c   : > { %v412_v11 = vmax.f32 %v408_v9, %v411_v10 }
 0x17e   : > { %v413_v12 = vsub.f32 %v408_v9, %v412_v11  ;;  %515 = vst.msk [vmem:[#allocation2] sm:$0xff] %vm323_vm2, %v412_v11  ;;  %418 = vperm.xlu0 %752, %v412_v11  }
 0x180   : > { %v414_v19 = vmul.f32 1.442695, %v413_v12 }
 0x1fd   : > { %v419_v14 = vpop.permute.xlu0 %418 }
 0x1fe   : > { %v421_v15 = vsub.f32 %v404_v5, %v419_v14 }
 0x200   : > { %v422_v16 = vmul.f32 1.442695, %v421_v15 }
 0x202   : > { %754 = vpow2.f32 %v422_v16 }
 0x203   : > { %756 = vpow2.f32 %v414_v19 }
 0x20c   : > { %v755_v17 = vpop.eup %754 }
 0x20d   : > { %706 = vmatmul.mubr.msk.f32.vlgmr.msra.gmra.mrb[0].mxu1 %vm326_vm0, %v755_v17  ;;  %v426_v18 = vsel %vm326_vm0, %v755_v17, 0.0  ;;  %v757_v20 = vpop.eup %756 }
 0x20e   : > { %427 = vadd.xlane.f32.xlu1 %v426_v18  ;;  %v425_v22 = vmul.f32 %v757_v20, %v424_v21 }
 0x21f   : > { %435 = vperm.xlu1 %753, %v757_v20  }
 0x29b   : > { %v428_v23 = vpop.xlane.xlu1 %427 }
 0x29c   : > { %v429_v24 = vadd.f32 %v428_v23, %v425_v22 }
 0x29e   : > { %431 = vst.msk [vmem:[#allocation3] sm:$0xff] %vm323_vm2, %v429_v24 }
 0x29f   : > { %v436_v27 = vpop.permute.xlu1 %435 }
 0x2a0   : > { %v438_v28 = vmul.f32 %v436_v27, %v432_v26 }
 0x2a5   : > { %v520_v25 = vld [vmem:[#allocation3] sm:$0xff] }
 0x2a6   : > { %523 = vperm.xlu1 %753, %v520_v25  }
 0x2e0   : > { %v509_v29 = vpop.f32.mrb[0].mxu1 }
 0x2e1   : > { %v513_v30 = vadd.f32 %v509_v29, %v438_v28  ;;  %v707_v31 = vpop.f32.mrb[1].mxu1 }
 0x2e3   : > { %514 = vst.msk [vmem:[#allocation4] sm:$0xff] %vm326_vm0, %v513_v30 }
 0x2ea   : > { %v519_v34 = vld [vmem:[#allocation4] sm:$0xff] }
 0x325   : > { %v524_v32 = vpop.permute.xlu1 %523 }
 0x326   : > { %758 = vrcp.f32 %v524_v32 }
 0x330   : > { %v759_v33 = vpop.eup %758 }
 0x331   : > { %v527_v35 = vmul.f32 %v759_v33, %v519_v34 }
 0x333   : > { %528 = vst.msk [vmem:[%s318_s6] sm:$0xff] %vm326_vm0, %v527_v35 }
 0x334 PF: > { %s13_s16 = sadd.s32 1, %s798_s16   ;;  %s903_s12 = smov %s790_s14 }
 0x335   : > { %p10_p7 = scmp.ge.s32.totalorder %s13_s16, 10   ;;  %s904_s13 = smov %s794_s15 }
 0x336   : > { %s905_s14 = smov %s908_s17  ;;  %s906_s15 = smov %s912_s18 }
 0x337   :  { %12 = sbr.rel (!%p10_p7) target bundleno = 3 (0x3), region = 76 }

</bundles_post_ra>
